<compile_context>
chip_gen: v5e
topology: v5e:2x2
jax: 0.10.0
libtpu: 0.0.40
codegen_flags: <defaults>
</compile_context>

<pallas_src>
import functools
import math

import jax
import jax.numpy as jnp
from jax.experimental import pallas as pl
from jax.experimental.pallas import tpu as pltpu  # noqa: F401  (TPU backend)

# ----------------------------- config ---------------------------------------
VOCAB = 100
TYPE_VOCAB = 2
MAX_POS = 16
HIDDEN = 32
NUM_HEADS = 2
HEAD_DIM = HIDDEN // NUM_HEADS
NUM_LAYERS = 2
INTERMEDIATE = 64
NUM_LABELS = 4
DROPOUT_PROB = 0.1
LN_EPS = 1e-12


# ----------------------------- kernel helpers -------------------------------
def _layernorm(x, g, b, eps):
    mean = jnp.mean(x, axis=-1, keepdims=True)
    var = jnp.mean(jnp.square(x - mean), axis=-1, keepdims=True)
    return (x - mean) * jax.lax.rsqrt(var + eps) * g + b


# ----------------------------- fully fused BERT kernel ----------------------
def _bert_kernel(x_ref, maskb_ref, embg_ref, embb_ref,
                 wqkv_ref, bqkv_ref, wo_ref, bo_ref,
                 ln1g_ref, ln1b_ref, w1_ref, b1_ref, w2_ref, b2_ref,
                 ln2g_ref, ln2b_ref,
                 drop_ref, fcw_ref, fcb_ref, lbl_ref,
                 loss_ref, pred_ref,
                 *, batch, seq, num_layers, num_heads, head_dim, scale, eps):
    hidden = num_heads * head_dim

    # Embedding LayerNorm.
    h = _layernorm(x_ref[...].astype(jnp.float32),
                   embg_ref[...], embb_ref[...], eps)             # [B*S, H]
    mask_bias = maskb_ref[...]                                    # [B, 1, S]

    # All encoder layers, statically unrolled (weights fully VMEM-resident).
    for l in range(num_layers):
        wqkv = wqkv_ref[l]                                        # [H, 3H]
        wo = wo_ref[l]                                            # [H, H]

        # Fused QKV projection: one [B*S, H] x [H, 3H] matmul.
        qkv = jnp.dot(h, wqkv, preferred_element_type=jnp.float32) + bqkv_ref[l]

        # Attention per head; output projection folded as per-head Wo row
        # slices (accumulated without a zero-init add).
        attn_out = None
        for head in range(num_heads):
            lo = head * head_dim
            qh = qkv[:, lo:lo + head_dim].reshape(batch, seq, head_dim)
            kh = qkv[:, hidden + lo:hidden + lo + head_dim].reshape(
                batch, seq, head_dim)
            vh = qkv[:, 2 * hidden + lo:2 * hidden + lo + head_dim].reshape(
                batch, seq, head_dim)
            s = jnp.einsum("bqd,bkd->bqk", qh, kh,
                           preferred_element_type=jnp.float32) * scale
            s = s + mask_bias
            m = jnp.max(s, axis=-1, keepdims=True)
            p = jnp.exp(s - m)
            p = p * pl.reciprocal(jnp.sum(p, axis=-1, keepdims=True),
                                  approx=True)
            ah = jnp.einsum("bqk,bkd->bqd", p, vh,
                            preferred_element_type=jnp.float32)
            ah = ah.reshape(batch * seq, head_dim)
            contrib = jnp.dot(ah, wo[lo:lo + head_dim, :],
                              preferred_element_type=jnp.float32)
            attn_out = contrib if attn_out is None else attn_out + contrib
        attn_out = attn_out + bo_ref[l]

        # Residual + LN1.
        h1 = _layernorm(h + attn_out, ln1g_ref[l], ln1b_ref[l], eps)

        # FFN (w1 + gelu, w2), residual + LN2.
        # TODO(synk): HF BertIntermediate uses exact (erf) GELU; tanh
        # approximation is used here (small numeric drift).
        ff = jnp.dot(h1, w1_ref[l], preferred_element_type=jnp.float32) + b1_ref[l]
        ff = jax.nn.gelu(ff, approximate=True)
        ff2 = jnp.dot(ff, w2_ref[l], preferred_element_type=jnp.float32) + b2_ref[l]
        h = _layernorm(h1 + ff2, ln2g_ref[l], ln2b_ref[l], eps)

    # ---------------- classifier tail (fused, no second launch) -------------
    cls = h.reshape(batch, seq, hidden)[:, 0, :]                  # [B, H]
    x = cls * drop_ref[...]                                       # dropout mask
    logits = jnp.dot(x, fcw_ref[...],
                     preferred_element_type=jnp.float32) + fcb_ref[...]  # [B, C]

    m = jnp.max(logits, axis=-1, keepdims=True)
    lse = m + jnp.log(jnp.sum(jnp.exp(logits - m), axis=-1, keepdims=True))
    col = jax.lax.broadcasted_iota(jnp.int32, logits.shape, 1)
    onehot = (col == lbl_ref[...]).astype(jnp.float32)
    picked = jnp.sum(logits * onehot, axis=-1, keepdims=True)
    nll = lse - picked                                            # [B, 1]
    loss_ref[...] = jnp.mean(nll, keepdims=True)                  # mean reduction

    is_max = logits == m
    pred_ref[...] = jnp.min(jnp.where(is_max, col, jnp.int32(2 ** 30)),
                            axis=-1, keepdims=True)


def fused_bert_call(emb, mask_bias3, emb_g, emb_b, layers, drop_mask,
                    fc_w, fc_b, labels, *, batch, seq):
    bs, hid = emb.shape
    c = fc_w.shape[1]
    num_layers = layers["wqkv"].shape[0]

    kernel = functools.partial(
        _bert_kernel, batch=batch, seq=seq, num_layers=num_layers,
        num_heads=NUM_HEADS, head_dim=HEAD_DIM,
        scale=1.0 / math.sqrt(HEAD_DIM), eps=LN_EPS)

    # No grid: everything (activations + ~60KB of stacked weights) fits in
    # VMEM as whole-array blocks; a single kernel invocation does the lot.
    loss, preds = pl.pallas_call(
        kernel,
        out_shape=(jax.ShapeDtypeStruct((1, 1), jnp.float32),
                   jax.ShapeDtypeStruct((batch, 1), jnp.int32)),
    )(emb, mask_bias3, emb_g.reshape(1, hid), emb_b.reshape(1, hid),
      layers["wqkv"], layers["bqkv"], layers["wo"], layers["bo"],
      layers["ln1_g"], layers["ln1_b"], layers["w1"], layers["b1"],
      layers["w2"], layers["b2"], layers["ln2_g"], layers["ln2_b"],
      drop_mask, fc_w, fc_b.reshape(1, c),
      labels.reshape(batch, 1).astype(jnp.int32))
    return loss[0, 0], preds[:, 0]


# ----------------------------- params ---------------------------------------
def init_params(key):
    def nrm(k, shape):
        return 0.02 * jax.random.normal(k, shape, dtype=jnp.float32)

    keys = jax.random.split(key, 4 + NUM_LAYERS)
    params = dict(
        word_emb=nrm(keys[0], (VOCAB, HIDDEN)),
        type_emb=nrm(keys[1], (TYPE_VOCAB, HIDDEN)),
        pos_emb=nrm(keys[2], (MAX_POS, HIDDEN)),
        emb_ln_g=jnp.ones((HIDDEN,), jnp.float32),
        emb_ln_b=jnp.zeros((HIDDEN,), jnp.float32),
        fc_w=nrm(keys[3], (HIDDEN, NUM_LABELS)),
        fc_b=jnp.zeros((NUM_LABELS,), jnp.float32),
    )
    names = ("wqkv", "bqkv", "wo", "bo", "ln1_g", "ln1_b",
             "w1", "b1", "w2", "b2", "ln2_g", "ln2_b")
    acc = {n: [] for n in names}
    for l in range(NUM_LAYERS):
        lk = jax.random.split(keys[4 + l], 6)
        wq = nrm(lk[0], (HIDDEN, HIDDEN))
        wk = nrm(lk[1], (HIDDEN, HIDDEN))
        wv = nrm(lk[2], (HIDDEN, HIDDEN))
        acc["wqkv"].append(jnp.concatenate([wq, wk, wv], axis=1))    # [H, 3H]
        acc["bqkv"].append(jnp.zeros((1, 3 * HIDDEN), jnp.float32))
        acc["wo"].append(nrm(lk[3], (HIDDEN, HIDDEN)))
        acc["bo"].append(jnp.zeros((1, HIDDEN), jnp.float32))
        acc["ln1_g"].append(jnp.ones((1, HIDDEN), jnp.float32))
        acc["ln1_b"].append(jnp.zeros((1, HIDDEN), jnp.float32))
        acc["w1"].append(nrm(lk[4], (HIDDEN, INTERMEDIATE)))
        acc["b1"].append(jnp.zeros((1, INTERMEDIATE), jnp.float32))
        acc["w2"].append(nrm(lk[5], (INTERMEDIATE, HIDDEN)))
        acc["b2"].append(jnp.zeros((1, HIDDEN), jnp.float32))
        acc["ln2_g"].append(jnp.ones((1, HIDDEN), jnp.float32))
        acc["ln2_b"].append(jnp.zeros((1, HIDDEN), jnp.float32))
    params["layers"] = {n: jnp.stack(v, axis=0) for n, v in acc.items()}
    return params


# ----------------------------- model ----------------------------------------
@functools.partial(jax.jit, static_argnames=("mode",))
def bert_forward(params, input_ids, token_type_ids, attention_mask, label_ids,
                 mode, dropout_rng=None):
    B, S = input_ids.shape
    H = HIDDEN

    # Embedding lookup (gather) is glue, done in plain JAX (fused under jit).
    emb = (params["word_emb"][input_ids]
           + params["type_emb"][token_type_ids]
           + params["pos_emb"][None, :S, :])                      # [B, S, H]
    mask_bias3 = ((1.0 - attention_mask.astype(jnp.float32))
                  * (-1e9)).reshape(B, 1, S)

    # Dropout only in train mode (matches nn.Dropout eval semantics).
    # TODO(synk): HF internal hidden/attention-prob dropouts (train mode) are
    # omitted; only the explicit classifier dropout of the module is modeled.
    if mode == "train" and DROPOUT_PROB > 0.0:
        if dropout_rng is None:
            # TODO(synk): deterministic fallback mask; pass dropout_rng for
            # proper per-step randomness in training.
            dropout_rng = jax.random.PRNGKey(0)
        keep = jax.random.bernoulli(dropout_rng, 1.0 - DROPOUT_PROB, (B, H))
        drop_mask = keep.astype(jnp.float32) / (1.0 - DROPOUT_PROB)
    else:
        drop_mask = jnp.ones((B, H), jnp.float32)

    loss, preds = fused_bert_call(
        emb.reshape(B * S, H).astype(jnp.float32), mask_bias3,
        params["emb_ln_g"], params["emb_ln_b"], params["layers"],
        drop_mask, params["fc_w"], params["fc_b"], label_ids,
        batch=B, seq=S)

    if mode == "train":
        return loss
    return loss, preds, label_ids


# TODO(synk): pretrained-checkpoint loading / tokenizer from the original
# module have no Pallas equivalent; parameters are synthetic and deterministic.

if __name__ == "__main__":
    key = jax.random.PRNGKey(0)
    pkey, ikey, lkey, dkey = jax.random.split(key, 4)
    params = init_params(pkey)

    B, S = 2, 8
    input_ids = jax.random.randint(ikey, (B, S), 0, VOCAB, dtype=jnp.int32)
    token_type_ids = jnp.zeros((B, S), jnp.int32).at[:, S // 2:].set(1)
    attention_mask = jnp.ones((B, S), jnp.int32).at[1, S - 2:].set(0)
    label_ids = jax.random.randint(lkey, (B,), 0, NUM_LABELS, dtype=jnp.int32)

    loss, preds, labels = bert_forward(params, input_ids, token_type_ids,
                                       attention_mask, label_ids, mode="eval")
    jax.block_until_ready((loss, preds, labels))

    train_loss = bert_forward(params, input_ids, token_type_ids,
                              attention_mask, label_ids, mode="train",
                              dropout_rng=dkey)
    jax.block_until_ready(train_loss)

    print("KERNEL_OK")
</pallas_src>

<mosaic_0001>
module attributes {stable_mosaic.version = 11 : i64} {
  func.func @_bert_kernel(%arg0: memref<16x32xf32, #tpu.memory_space<vmem>>, %arg1: memref<2x1x8xf32, #tpu.memory_space<vmem>>, %arg2: memref<1x32xf32, #tpu.memory_space<vmem>>, %arg3: memref<1x32xf32, #tpu.memory_space<vmem>>, %arg4: memref<2x32x96xf32, #tpu.memory_space<vmem>>, %arg5: memref<2x1x96xf32, #tpu.memory_space<vmem>>, %arg6: memref<2x32x32xf32, #tpu.memory_space<vmem>>, %arg7: memref<2x1x32xf32, #tpu.memory_space<vmem>>, %arg8: memref<2x1x32xf32, #tpu.memory_space<vmem>>, %arg9: memref<2x1x32xf32, #tpu.memory_space<vmem>>, %arg10: memref<2x32x64xf32, #tpu.memory_space<vmem>>, %arg11: memref<2x1x64xf32, #tpu.memory_space<vmem>>, %arg12: memref<2x64x32xf32, #tpu.memory_space<vmem>>, %arg13: memref<2x1x32xf32, #tpu.memory_space<vmem>>, %arg14: memref<2x1x32xf32, #tpu.memory_space<vmem>>, %arg15: memref<2x1x32xf32, #tpu.memory_space<vmem>>, %arg16: memref<2x32xf32, #tpu.memory_space<vmem>>, %arg17: memref<32x4xf32, #tpu.memory_space<vmem>>, %arg18: memref<1x4xf32, #tpu.memory_space<vmem>>, %arg19: memref<2x1xi32, #tpu.memory_space<vmem>>, %arg20: memref<1x1xf32, #tpu.memory_space<vmem>>, %arg21: memref<2x1xi32, #tpu.memory_space<vmem>>) attributes {dimension_semantics = [], scalar_prefetch = 0 : i64, scratch_operands = 0 : i64, tpu.core_type = #tpu.core_type<tc>} {
    %c0 = arith.constant 0 : index
    %c0_0 = arith.constant 0 : index
    %0 = vector.load %arg0[%c0, %c0_0] : memref<16x32xf32, #tpu.memory_space<vmem>>, vector<16x32xf32>
    %c0_1 = arith.constant 0 : index
    %c0_2 = arith.constant 0 : index
    %1 = vector.load %arg2[%c0_1, %c0_2] : memref<1x32xf32, #tpu.memory_space<vmem>>, vector<1x32xf32>
    %c0_3 = arith.constant 0 : index
    %c0_4 = arith.constant 0 : index
    %2 = vector.load %arg3[%c0_3, %c0_4] : memref<1x32xf32, #tpu.memory_space<vmem>>, vector<1x32xf32>
    %cst = arith.constant dense<0.000000e+00> : vector<16xf32>
    %3 = vector.multi_reduction <add>, %0, %cst [1] : vector<16x32xf32> to vector<16xf32>
    %4 = vector.shape_cast %3 : vector<16xf32> to vector<16x1xf32>
    %cst_5 = arith.constant 3.200000e+01 : f32
    %5 = vector.broadcast %cst_5 : f32 to vector<16x1xf32>
    %6 = arith.divf %4, %5 : vector<16x1xf32>
    %7 = vector.broadcast %6 : vector<16x1xf32> to vector<16x32xf32>
    %8 = arith.subf %0, %7 : vector<16x32xf32>
    %9 = arith.mulf %8, %8 : vector<16x32xf32>
    %cst_6 = arith.constant dense<0.000000e+00> : vector<16xf32>
    %10 = vector.multi_reduction <add>, %9, %cst_6 [1] : vector<16x32xf32> to vector<16xf32>
    %11 = vector.shape_cast %10 : vector<16xf32> to vector<16x1xf32>
    %cst_7 = arith.constant 3.200000e+01 : f32
    %12 = vector.broadcast %cst_7 : f32 to vector<16x1xf32>
    %13 = arith.divf %11, %12 : vector<16x1xf32>
    %14 = vector.broadcast %6 : vector<16x1xf32> to vector<16x32xf32>
    %15 = arith.subf %0, %14 : vector<16x32xf32>
    %cst_8 = arith.constant 9.99999996E-13 : f32
    %16 = vector.broadcast %cst_8 : f32 to vector<16x1xf32>
    %17 = arith.addf %13, %16 : vector<16x1xf32>
    %18 = math.rsqrt %17 : vector<16x1xf32>
    %19 = vector.broadcast %18 : vector<16x1xf32> to vector<16x32xf32>
    %20 = arith.mulf %15, %19 : vector<16x32xf32>
    %21 = vector.broadcast %1 : vector<1x32xf32> to vector<16x32xf32>
    %22 = arith.mulf %20, %21 : vector<16x32xf32>
    %23 = vector.broadcast %2 : vector<1x32xf32> to vector<16x32xf32>
    %24 = arith.addf %22, %23 : vector<16x32xf32>
    %c0_9 = arith.constant 0 : index
    %c0_10 = arith.constant 0 : index
    %c0_11 = arith.constant 0 : index
    %25 = vector.load %arg1[%c0_9, %c0_10, %c0_11] : memref<2x1x8xf32, #tpu.memory_space<vmem>>, vector<2x1x8xf32>
    %c0_12 = arith.constant 0 : index
    %c0_13 = arith.constant 0 : index
    %c0_14 = arith.constant 0 : index
    %26 = vector.load %arg4[%c0_12, %c0_13, %c0_14] : memref<2x32x96xf32, #tpu.memory_space<vmem>>, vector<1x32x96xf32>
    %27 = vector.shape_cast %26 : vector<1x32x96xf32> to vector<32x96xf32>
    %c0_15 = arith.constant 0 : index
    %c0_16 = arith.constant 0 : index
    %c0_17 = arith.constant 0 : index
    %28 = vector.load %arg6[%c0_15, %c0_16, %c0_17] : memref<2x32x32xf32, #tpu.memory_space<vmem>>, vector<1x32x32xf32>
    %29 = vector.shape_cast %28 : vector<1x32x32xf32> to vector<32x32xf32>
    %cst_18 = arith.constant dense<0.000000e+00> : vector<16x96xf32>
    %30 = tpu.matmul %24, %27, %cst_18 {dimension_numbers = #tpu.dot_dimension_numbers<[1], [0], [0], [1], [0, 0, 1, 1], [], []>} : vector<16x32xf32>, vector<32x96xf32>, vector<16x96xf32> -> vector<16x96xf32>
    %c0_19 = arith.constant 0 : index
    %c0_20 = arith.constant 0 : index
    %c0_21 = arith.constant 0 : index
    %31 = vector.load %arg5[%c0_19, %c0_20, %c0_21] : memref<2x1x96xf32, #tpu.memory_space<vmem>>, vector<1x1x96xf32>
    %32 = vector.shape_cast %31 : vector<1x1x96xf32> to vector<1x96xf32>
    %33 = vector.broadcast %32 : vector<1x96xf32> to vector<16x96xf32>
    %34 = arith.addf %30, %33 : vector<16x96xf32>
    %35 = vector.extract_strided_slice %34 {offsets = [0, 0], sizes = [16, 16], strides = [1, 1]} : vector<16x96xf32> to vector<16x16xf32>
    %36 = vector.shape_cast %35 : vector<16x16xf32> to vector<2x8x16xf32>
    %37 = vector.extract_strided_slice %34 {offsets = [0, 32], sizes = [16, 16], strides = [1, 1]} : vector<16x96xf32> to vector<16x16xf32>
    %38 = vector.shape_cast %37 : vector<16x16xf32> to vector<2x8x16xf32>
    %39 = vector.extract_strided_slice %34 {offsets = [0, 64], sizes = [16, 16], strides = [1, 1]} : vector<16x96xf32> to vector<16x16xf32>
    %40 = vector.shape_cast %39 : vector<16x16xf32> to vector<2x8x16xf32>
    "tpu.trace_start"() <{level = 10 : i32, message = "bqd,bkd->bqk"}> : () -> ()
    %cst_22 = arith.constant dense<0.000000e+00> : vector<2x8x8xf32>
    %41 = tpu.matmul %36, %38, %cst_22 {dimension_numbers = #tpu.dot_dimension_numbers<[2], [2], [1], [1], [0, 0, 0, 1, 1, 1], [0], [0]>} : vector<2x8x16xf32>, vector<2x8x16xf32>, vector<2x8x8xf32> -> vector<2x8x8xf32>
    "tpu.trace_stop"() : () -> ()
    %cst_23 = arith.constant 2.500000e-01 : f32
    %42 = vector.broadcast %cst_23 : f32 to vector<2x8x8xf32>
    %43 = arith.mulf %41, %42 : vector<2x8x8xf32>
    %44 = vector.broadcast %25 : vector<2x1x8xf32> to vector<2x8x8xf32>
    %45 = arith.addf %43, %44 : vector<2x8x8xf32>
    %cst_24 = arith.constant dense<0xFF800000> : vector<2x8xf32>
    %46 = vector.multi_reduction <maximumf>, %45, %cst_24 [2] : vector<2x8x8xf32> to vector<2x8xf32>
    %47 = vector.shape_cast %46 : vector<2x8xf32> to vector<2x8x1xf32>
    %48 = vector.broadcast %47 : vector<2x8x1xf32> to vector<2x8x8xf32>
    %49 = arith.subf %45, %48 : vector<2x8x8xf32>
    %50 = math.exp %49 : vector<2x8x8xf32>
    %cst_25 = arith.constant dense<0.000000e+00> : vector<2x8xf32>
    %51 = vector.multi_reduction <add>, %50, %cst_25 [2] : vector<2x8x8xf32> to vector<2x8xf32>
    %52 = vector.shape_cast %51 : vector<2x8xf32> to vector<2x8x1xf32>
    %53 = tpu.reciprocal %52 {approx = true} : vector<2x8x1xf32> -> vector<2x8x1xf32>
    %54 = vector.broadcast %53 : vector<2x8x1xf32> to vector<2x8x8xf32>
    %55 = arith.mulf %50, %54 : vector<2x8x8xf32>
    "tpu.trace_start"() <{level = 10 : i32, message = "bqk,bkd->bqd"}> : () -> ()
    %cst_26 = arith.constant dense<0.000000e+00> : vector<2x8x16xf32>
    %56 = tpu.matmul %55, %40, %cst_26 {dimension_numbers = #tpu.dot_dimension_numbers<[2], [1], [1], [2], [0, 0, 0, 1, 1, 2], [0], [0]>} : vector<2x8x8xf32>, vector<2x8x16xf32>, vector<2x8x16xf32> -> vector<2x8x16xf32>
    "tpu.trace_stop"() : () -> ()
    %57 = vector.shape_cast %56 : vector<2x8x16xf32> to vector<16x16xf32>
    %58 = vector.extract_strided_slice %29 {offsets = [0, 0], sizes = [16, 32], strides = [1, 1]} : vector<32x32xf32> to vector<16x32xf32>
    %cst_27 = arith.constant dense<0.000000e+00> : vector<16x32xf32>
    %59 = tpu.matmul %57, %58, %cst_27 {dimension_numbers = #tpu.dot_dimension_numbers<[1], [0], [0], [1], [0, 0, 1, 1], [], []>} : vector<16x16xf32>, vector<16x32xf32>, vector<16x32xf32> -> vector<16x32xf32>
    %60 = vector.extract_strided_slice %34 {offsets = [0, 16], sizes = [16, 16], strides = [1, 1]} : vector<16x96xf32> to vector<16x16xf32>
    %61 = vector.shape_cast %60 : vector<16x16xf32> to vector<2x8x16xf32>
    %62 = vector.extract_strided_slice %34 {offsets = [0, 48], sizes = [16, 16], strides = [1, 1]} : vector<16x96xf32> to vector<16x16xf32>
    %63 = vector.shape_cast %62 : vector<16x16xf32> to vector<2x8x16xf32>
    %64 = vector.extract_strided_slice %34 {offsets = [0, 80], sizes = [16, 16], strides = [1, 1]} : vector<16x96xf32> to vector<16x16xf32>
    %65 = vector.shape_cast %64 : vector<16x16xf32> to vector<2x8x16xf32>
    "tpu.trace_start"() <{level = 10 : i32, message = "bqd,bkd->bqk"}> : () -> ()
    %cst_28 = arith.constant dense<0.000000e+00> : vector<2x8x8xf32>
    %66 = tpu.matmul %61, %63, %cst_28 {dimension_numbers = #tpu.dot_dimension_numbers<[2], [2], [1], [1], [0, 0, 0, 1, 1, 1], [0], [0]>} : vector<2x8x16xf32>, vector<2x8x16xf32>, vector<2x8x8xf32> -> vector<2x8x8xf32>
    "tpu.trace_stop"() : () -> ()
    %cst_29 = arith.constant 2.500000e-01 : f32
    %67 = vector.broadcast %cst_29 : f32 to vector<2x8x8xf32>
    %68 = arith.mulf %66, %67 : vector<2x8x8xf32>
    %69 = vector.broadcast %25 : vector<2x1x8xf32> to vector<2x8x8xf32>
    %70 = arith.addf %68, %69 : vector<2x8x8xf32>
    %cst_30 = arith.constant dense<0xFF800000> : vector<2x8xf32>
    %71 = vector.multi_reduction <maximumf>, %70, %cst_30 [2] : vector<2x8x8xf32> to vector<2x8xf32>
    %72 = vector.shape_cast %71 : vector<2x8xf32> to vector<2x8x1xf32>
    %73 = vector.broadcast %72 : vector<2x8x1xf32> to vector<2x8x8xf32>
    %74 = arith.subf %70, %73 : vector<2x8x8xf32>
    %75 = math.exp %74 : vector<2x8x8xf32>
    %cst_31 = arith.constant dense<0.000000e+00> : vector<2x8xf32>
    %76 = vector.multi_reduction <add>, %75, %cst_31 [2] : vector<2x8x8xf32> to vector<2x8xf32>
    %77 = vector.shape_cast %76 : vector<2x8xf32> to vector<2x8x1xf32>
    %78 = tpu.reciprocal %77 {approx = true} : vector<2x8x1xf32> -> vector<2x8x1xf32>
    %79 = vector.broadcast %78 : vector<2x8x1xf32> to vector<2x8x8xf32>
    %80 = arith.mulf %75, %79 : vector<2x8x8xf32>
    "tpu.trace_start"() <{level = 10 : i32, message = "bqk,bkd->bqd"}> : () -> ()
    %cst_32 = arith.constant dense<0.000000e+00> : vector<2x8x16xf32>
    %81 = tpu.matmul %80, %65, %cst_32 {dimension_numbers = #tpu.dot_dimension_numbers<[2], [1], [1], [2], [0, 0, 0, 1, 1, 2], [0], [0]>} : vector<2x8x8xf32>, vector<2x8x16xf32>, vector<2x8x16xf32> -> vector<2x8x16xf32>
    "tpu.trace_stop"() : () -> ()
    %82 = vector.shape_cast %81 : vector<2x8x16xf32> to vector<16x16xf32>
    %83 = vector.extract_strided_slice %29 {offsets = [16, 0], sizes = [16, 32], strides = [1, 1]} : vector<32x32xf32> to vector<16x32xf32>
    %cst_33 = arith.constant dense<0.000000e+00> : vector<16x32xf32>
    %84 = tpu.matmul %82, %83, %cst_33 {dimension_numbers = #tpu.dot_dimension_numbers<[1], [0], [0], [1], [0, 0, 1, 1], [], []>} : vector<16x16xf32>, vector<16x32xf32>, vector<16x32xf32> -> vector<16x32xf32>
    %85 = arith.addf %59, %84 : vector<16x32xf32>
    %c0_34 = arith.constant 0 : index
    %c0_35 = arith.constant 0 : index
    %c0_36 = arith.constant 0 : index
    %86 = vector.load %arg7[%c0_34, %c0_35, %c0_36] : memref<2x1x32xf32, #tpu.memory_space<vmem>>, vector<1x1x32xf32>
    %87 = vector.shape_cast %86 : vector<1x1x32xf32> to vector<1x32xf32>
    %88 = vector.broadcast %87 : vector<1x32xf32> to vector<16x32xf32>
    %89 = arith.addf %85, %88 : vector<16x32xf32>
    %90 = arith.addf %24, %89 : vector<16x32xf32>
    %c0_37 = arith.constant 0 : index
    %c0_38 = arith.constant 0 : index
    %c0_39 = arith.constant 0 : index
    %91 = vector.load %arg8[%c0_37, %c0_38, %c0_39] : memref<2x1x32xf32, #tpu.memory_space<vmem>>, vector<1x1x32xf32>
    %92 = vector.shape_cast %91 : vector<1x1x32xf32> to vector<1x32xf32>
    %c0_40 = arith.constant 0 : index
    %c0_41 = arith.constant 0 : index
    %c0_42 = arith.constant 0 : index
    %93 = vector.load %arg9[%c0_40, %c0_41, %c0_42] : memref<2x1x32xf32, #tpu.memory_space<vmem>>, vector<1x1x32xf32>
    %94 = vector.shape_cast %93 : vector<1x1x32xf32> to vector<1x32xf32>
    %cst_43 = arith.constant dense<0.000000e+00> : vector<16xf32>
    %95 = vector.multi_reduction <add>, %90, %cst_43 [1] : vector<16x32xf32> to vector<16xf32>
    %96 = vector.shape_cast %95 : vector<16xf32> to vector<16x1xf32>
    %cst_44 = arith.constant 3.200000e+01 : f32
    %97 = vector.broadcast %cst_44 : f32 to vector<16x1xf32>
    %98 = arith.divf %96, %97 : vector<16x1xf32>
    %99 = vector.broadcast %98 : vector<16x1xf32> to vector<16x32xf32>
    %100 = arith.subf %90, %99 : vector<16x32xf32>
    %101 = arith.mulf %100, %100 : vector<16x32xf32>
    %cst_45 = arith.constant dense<0.000000e+00> : vector<16xf32>
    %102 = vector.multi_reduction <add>, %101, %cst_45 [1] : vector<16x32xf32> to vector<16xf32>
    %103 = vector.shape_cast %102 : vector<16xf32> to vector<16x1xf32>
    %cst_46 = arith.constant 3.200000e+01 : f32
    %104 = vector.broadcast %cst_46 : f32 to vector<16x1xf32>
    %105 = arith.divf %103, %104 : vector<16x1xf32>
    %106 = vector.broadcast %98 : vector<16x1xf32> to vector<16x32xf32>
    %107 = arith.subf %90, %106 : vector<16x32xf32>
    %cst_47 = arith.constant 9.99999996E-13 : f32
    %108 = vector.broadcast %cst_47 : f32 to vector<16x1xf32>
    %109 = arith.addf %105, %108 : vector<16x1xf32>
    %110 = math.rsqrt %109 : vector<16x1xf32>
    %111 = vector.broadcast %110 : vector<16x1xf32> to vector<16x32xf32>
    %112 = arith.mulf %107, %111 : vector<16x32xf32>
    %113 = vector.broadcast %92 : vector<1x32xf32> to vector<16x32xf32>
    %114 = arith.mulf %112, %113 : vector<16x32xf32>
    %115 = vector.broadcast %94 : vector<1x32xf32> to vector<16x32xf32>
    %116 = arith.addf %114, %115 : vector<16x32xf32>
    %c0_48 = arith.constant 0 : index
    %c0_49 = arith.constant 0 : index
    %c0_50 = arith.constant 0 : index
    %117 = vector.load %arg10[%c0_48, %c0_49, %c0_50] : memref<2x32x64xf32, #tpu.memory_space<vmem>>, vector<1x32x64xf32>
    %118 = vector.shape_cast %117 : vector<1x32x64xf32> to vector<32x64xf32>
    %cst_51 = arith.constant dense<0.000000e+00> : vector<16x64xf32>
    %119 = tpu.matmul %116, %118, %cst_51 {dimension_numbers = #tpu.dot_dimension_numbers<[1], [0], [0], [1], [0, 0, 1, 1], [], []>} : vector<16x32xf32>, vector<32x64xf32>, vector<16x64xf32> -> vector<16x64xf32>
    %c0_52 = arith.constant 0 : index
    %c0_53 = arith.constant 0 : index
    %c0_54 = arith.constant 0 : index
    %120 = vector.load %arg11[%c0_52, %c0_53, %c0_54] : memref<2x1x64xf32, #tpu.memory_space<vmem>>, vector<1x1x64xf32>
    %121 = vector.shape_cast %120 : vector<1x1x64xf32> to vector<1x64xf32>
    %122 = vector.broadcast %121 : vector<1x64xf32> to vector<16x64xf32>
    %123 = arith.addf %119, %122 : vector<16x64xf32>
    %124 = arith.mulf %123, %123 : vector<16x64xf32>
    %125 = arith.mulf %123, %124 : vector<16x64xf32>
    %cst_55 = arith.constant 4.471500e-02 : f32
    %126 = vector.broadcast %cst_55 : f32 to vector<16x64xf32>
    %127 = arith.mulf %126, %125 : vector<16x64xf32>
    %128 = arith.addf %123, %127 : vector<16x64xf32>
    %cst_56 = arith.constant 0.797884583 : f32
    %129 = vector.broadcast %cst_56 : f32 to vector<16x64xf32>
    %130 = arith.mulf %129, %128 : vector<16x64xf32>
    %131 = math.tanh %130 : vector<16x64xf32>
    %cst_57 = arith.constant 1.000000e+00 : f32
    %132 = vector.broadcast %cst_57 : f32 to vector<16x64xf32>
    %133 = arith.addf %132, %131 : vector<16x64xf32>
    %cst_58 = arith.constant 5.000000e-01 : f32
    %134 = vector.broadcast %cst_58 : f32 to vector<16x64xf32>
    %135 = arith.mulf %134, %133 : vector<16x64xf32>
    %136 = arith.mulf %123, %135 : vector<16x64xf32>
    %c0_59 = arith.constant 0 : index
    %c0_60 = arith.constant 0 : index
    %c0_61 = arith.constant 0 : index
    %137 = vector.load %arg12[%c0_59, %c0_60, %c0_61] : memref<2x64x32xf32, #tpu.memory_space<vmem>>, vector<1x64x32xf32>
    %138 = vector.shape_cast %137 : vector<1x64x32xf32> to vector<64x32xf32>
    %cst_62 = arith.constant dense<0.000000e+00> : vector<16x32xf32>
    %139 = tpu.matmul %136, %138, %cst_62 {dimension_numbers = #tpu.dot_dimension_numbers<[1], [0], [0], [1], [0, 0, 1, 1], [], []>} : vector<16x64xf32>, vector<64x32xf32>, vector<16x32xf32> -> vector<16x32xf32>
    %c0_63 = arith.constant 0 : index
    %c0_64 = arith.constant 0 : index
    %c0_65 = arith.constant 0 : index
    %140 = vector.load %arg13[%c0_63, %c0_64, %c0_65] : memref<2x1x32xf32, #tpu.memory_space<vmem>>, vector<1x1x32xf32>
    %141 = vector.shape_cast %140 : vector<1x1x32xf32> to vector<1x32xf32>
    %142 = vector.broadcast %141 : vector<1x32xf32> to vector<16x32xf32>
    %143 = arith.addf %139, %142 : vector<16x32xf32>
    %144 = arith.addf %116, %143 : vector<16x32xf32>
    %c0_66 = arith.constant 0 : index
    %c0_67 = arith.constant 0 : index
    %c0_68 = arith.constant 0 : index
    %145 = vector.load %arg14[%c0_66, %c0_67, %c0_68] : memref<2x1x32xf32, #tpu.memory_space<vmem>>, vector<1x1x32xf32>
    %146 = vector.shape_cast %145 : vector<1x1x32xf32> to vector<1x32xf32>
    %c0_69 = arith.constant 0 : index
    %c0_70 = arith.constant 0 : index
    %c0_71 = arith.constant 0 : index
    %147 = vector.load %arg15[%c0_69, %c0_70, %c0_71] : memref<2x1x32xf32, #tpu.memory_space<vmem>>, vector<1x1x32xf32>
    %148 = vector.shape_cast %147 : vector<1x1x32xf32> to vector<1x32xf32>
    %cst_72 = arith.constant dense<0.000000e+00> : vector<16xf32>
    %149 = vector.multi_reduction <add>, %144, %cst_72 [1] : vector<16x32xf32> to vector<16xf32>
    %150 = vector.shape_cast %149 : vector<16xf32> to vector<16x1xf32>
    %cst_73 = arith.constant 3.200000e+01 : f32
    %151 = vector.broadcast %cst_73 : f32 to vector<16x1xf32>
    %152 = arith.divf %150, %151 : vector<16x1xf32>
    %153 = vector.broadcast %152 : vector<16x1xf32> to vector<16x32xf32>
    %154 = arith.subf %144, %153 : vector<16x32xf32>
    %155 = arith.mulf %154, %154 : vector<16x32xf32>
    %cst_74 = arith.constant dense<0.000000e+00> : vector<16xf32>
    %156 = vector.multi_reduction <add>, %155, %cst_74 [1] : vector<16x32xf32> to vector<16xf32>
    %157 = vector.shape_cast %156 : vector<16xf32> to vector<16x1xf32>
    %cst_75 = arith.constant 3.200000e+01 : f32
    %158 = vector.broadcast %cst_75 : f32 to vector<16x1xf32>
    %159 = arith.divf %157, %158 : vector<16x1xf32>
    %160 = vector.broadcast %152 : vector<16x1xf32> to vector<16x32xf32>
    %161 = arith.subf %144, %160 : vector<16x32xf32>
    %cst_76 = arith.constant 9.99999996E-13 : f32
    %162 = vector.broadcast %cst_76 : f32 to vector<16x1xf32>
    %163 = arith.addf %159, %162 : vector<16x1xf32>
    %164 = math.rsqrt %163 : vector<16x1xf32>
    %165 = vector.broadcast %164 : vector<16x1xf32> to vector<16x32xf32>
    %166 = arith.mulf %161, %165 : vector<16x32xf32>
    %167 = vector.broadcast %146 : vector<1x32xf32> to vector<16x32xf32>
    %168 = arith.mulf %166, %167 : vector<16x32xf32>
    %169 = vector.broadcast %148 : vector<1x32xf32> to vector<16x32xf32>
    %170 = arith.addf %168, %169 : vector<16x32xf32>
    %c1 = arith.constant 1 : index
    %c0_77 = arith.constant 0 : index
    %c0_78 = arith.constant 0 : index
    %171 = vector.load %arg4[%c1, %c0_77, %c0_78] : memref<2x32x96xf32, #tpu.memory_space<vmem>>, vector<1x32x96xf32>
    %172 = vector.shape_cast %171 : vector<1x32x96xf32> to vector<32x96xf32>
    %c1_79 = arith.constant 1 : index
    %c0_80 = arith.constant 0 : index
    %c0_81 = arith.constant 0 : index
    %173 = vector.load %arg6[%c1_79, %c0_80, %c0_81] : memref<2x32x32xf32, #tpu.memory_space<vmem>>, vector<1x32x32xf32>
    %174 = vector.shape_cast %173 : vector<1x32x32xf32> to vector<32x32xf32>
    %cst_82 = arith.constant dense<0.000000e+00> : vector<16x96xf32>
    %175 = tpu.matmul %170, %172, %cst_82 {dimension_numbers = #tpu.dot_dimension_numbers<[1], [0], [0], [1], [0, 0, 1, 1], [], []>} : vector<16x32xf32>, vector<32x96xf32>, vector<16x96xf32> -> vector<16x96xf32>
    %c1_83 = arith.constant 1 : index
    %c0_84 = arith.constant 0 : index
    %c0_85 = arith.constant 0 : index
    %176 = vector.load %arg5[%c1_83, %c0_84, %c0_85] : memref<2x1x96xf32, #tpu.memory_space<vmem>>, vector<1x1x96xf32>
    %177 = vector.shape_cast %176 : vector<1x1x96xf32> to vector<1x96xf32>
    %178 = vector.broadcast %177 : vector<1x96xf32> to vector<16x96xf32>
    %179 = arith.addf %175, %178 : vector<16x96xf32>
    %180 = vector.extract_strided_slice %179 {offsets = [0, 0], sizes = [16, 16], strides = [1, 1]} : vector<16x96xf32> to vector<16x16xf32>
    %181 = vector.shape_cast %180 : vector<16x16xf32> to vector<2x8x16xf32>
    %182 = vector.extract_strided_slice %179 {offsets = [0, 32], sizes = [16, 16], strides = [1, 1]} : vector<16x96xf32> to vector<16x16xf32>
    %183 = vector.shape_cast %182 : vector<16x16xf32> to vector<2x8x16xf32>
    %184 = vector.extract_strided_slice %179 {offsets = [0, 64], sizes = [16, 16], strides = [1, 1]} : vector<16x96xf32> to vector<16x16xf32>
    %185 = vector.shape_cast %184 : vector<16x16xf32> to vector<2x8x16xf32>
    "tpu.trace_start"() <{level = 10 : i32, message = "bqd,bkd->bqk"}> : () -> ()
    %cst_86 = arith.constant dense<0.000000e+00> : vector<2x8x8xf32>
    %186 = tpu.matmul %181, %183, %cst_86 {dimension_numbers = #tpu.dot_dimension_numbers<[2], [2], [1], [1], [0, 0, 0, 1, 1, 1], [0], [0]>} : vector<2x8x16xf32>, vector<2x8x16xf32>, vector<2x8x8xf32> -> vector<2x8x8xf32>
    "tpu.trace_stop"() : () -> ()
    %cst_87 = arith.constant 2.500000e-01 : f32
    %187 = vector.broadcast %cst_87 : f32 to vector<2x8x8xf32>
    %188 = arith.mulf %186, %187 : vector<2x8x8xf32>
    %189 = vector.broadcast %25 : vector<2x1x8xf32> to vector<2x8x8xf32>
    %190 = arith.addf %188, %189 : vector<2x8x8xf32>
    %cst_88 = arith.constant dense<0xFF800000> : vector<2x8xf32>
    %191 = vector.multi_reduction <maximumf>, %190, %cst_88 [2] : vector<2x8x8xf32> to vector<2x8xf32>
    %192 = vector.shape_cast %191 : vector<2x8xf32> to vector<2x8x1xf32>
    %193 = vector.broadcast %192 : vector<2x8x1xf32> to vector<2x8x8xf32>
    %194 = arith.subf %190, %193 : vector<2x8x8xf32>
    %195 = math.exp %194 : vector<2x8x8xf32>
    %cst_89 = arith.constant dense<0.000000e+00> : vector<2x8xf32>
    %196 = vector.multi_reduction <add>, %195, %cst_89 [2] : vector<2x8x8xf32> to vector<2x8xf32>
    %197 = vector.shape_cast %196 : vector<2x8xf32> to vector<2x8x1xf32>
    %198 = tpu.reciprocal %197 {approx = true} : vector<2x8x1xf32> -> vector<2x8x1xf32>
    %199 = vector.broadcast %198 : vector<2x8x1xf32> to vector<2x8x8xf32>
    %200 = arith.mulf %195, %199 : vector<2x8x8xf32>
    "tpu.trace_start"() <{level = 10 : i32, message = "bqk,bkd->bqd"}> : () -> ()
    %cst_90 = arith.constant dense<0.000000e+00> : vector<2x8x16xf32>
    %201 = tpu.matmul %200, %185, %cst_90 {dimension_numbers = #tpu.dot_dimension_numbers<[2], [1], [1], [2], [0, 0, 0, 1, 1, 2], [0], [0]>} : vector<2x8x8xf32>, vector<2x8x16xf32>, vector<2x8x16xf32> -> vector<2x8x16xf32>
    "tpu.trace_stop"() : () -> ()
    %202 = vector.shape_cast %201 : vector<2x8x16xf32> to vector<16x16xf32>
    %203 = vector.extract_strided_slice %174 {offsets = [0, 0], sizes = [16, 32], strides = [1, 1]} : vector<32x32xf32> to vector<16x32xf32>
    %cst_91 = arith.constant dense<0.000000e+00> : vector<16x32xf32>
    %204 = tpu.matmul %202, %203, %cst_91 {dimension_numbers = #tpu.dot_dimension_numbers<[1], [0], [0], [1], [0, 0, 1, 1], [], []>} : vector<16x16xf32>, vector<16x32xf32>, vector<16x32xf32> -> vector<16x32xf32>
    %205 = vector.extract_strided_slice %179 {offsets = [0, 16], sizes = [16, 16], strides = [1, 1]} : vector<16x96xf32> to vector<16x16xf32>
    %206 = vector.shape_cast %205 : vector<16x16xf32> to vector<2x8x16xf32>
    %207 = vector.extract_strided_slice %179 {offsets = [0, 48], sizes = [16, 16], strides = [1, 1]} : vector<16x96xf32> to vector<16x16xf32>
    %208 = vector.shape_cast %207 : vector<16x16xf32> to vector<2x8x16xf32>
    %209 = vector.extract_strided_slice %179 {offsets = [0, 80], sizes = [16, 16], strides = [1, 1]} : vector<16x96xf32> to vector<16x16xf32>
    %210 = vector.shape_cast %209 : vector<16x16xf32> to vector<2x8x16xf32>
    "tpu.trace_start"() <{level = 10 : i32, message = "bqd,bkd->bqk"}> : () -> ()
    %cst_92 = arith.constant dense<0.000000e+00> : vector<2x8x8xf32>
    %211 = tpu.matmul %206, %208, %cst_92 {dimension_numbers = #tpu.dot_dimension_numbers<[2], [2], [1], [1], [0, 0, 0, 1, 1, 1], [0], [0]>} : vector<2x8x16xf32>, vector<2x8x16xf32>, vector<2x8x8xf32> -> vector<2x8x8xf32>
    "tpu.trace_stop"() : () -> ()
    %cst_93 = arith.constant 2.500000e-01 : f32
    %212 = vector.broadcast %cst_93 : f32 to vector<2x8x8xf32>
    %213 = arith.mulf %211, %212 : vector<2x8x8xf32>
    %214 = vector.broadcast %25 : vector<2x1x8xf32> to vector<2x8x8xf32>
    %215 = arith.addf %213, %214 : vector<2x8x8xf32>
    %cst_94 = arith.constant dense<0xFF800000> : vector<2x8xf32>
    %216 = vector.multi_reduction <maximumf>, %215, %cst_94 [2] : vector<2x8x8xf32> to vector<2x8xf32>
    %217 = vector.shape_cast %216 : vector<2x8xf32> to vector<2x8x1xf32>
    %218 = vector.broadcast %217 : vector<2x8x1xf32> to vector<2x8x8xf32>
    %219 = arith.subf %215, %218 : vector<2x8x8xf32>
    %220 = math.exp %219 : vector<2x8x8xf32>
    %cst_95 = arith.constant dense<0.000000e+00> : vector<2x8xf32>
    %221 = vector.multi_reduction <add>, %220, %cst_95 [2] : vector<2x8x8xf32> to vector<2x8xf32>
    %222 = vector.shape_cast %221 : vector<2x8xf32> to vector<2x8x1xf32>
    %223 = tpu.reciprocal %222 {approx = true} : vector<2x8x1xf32> -> vector<2x8x1xf32>
    %224 = vector.broadcast %223 : vector<2x8x1xf32> to vector<2x8x8xf32>
    %225 = arith.mulf %220, %224 : vector<2x8x8xf32>
    "tpu.trace_start"() <{level = 10 : i32, message = "bqk,bkd->bqd"}> : () -> ()
    %cst_96 = arith.constant dense<0.000000e+00> : vector<2x8x16xf32>
    %226 = tpu.matmul %225, %210, %cst_96 {dimension_numbers = #tpu.dot_dimension_numbers<[2], [1], [1], [2], [0, 0, 0, 1, 1, 2], [0], [0]>} : vector<2x8x8xf32>, vector<2x8x16xf32>, vector<2x8x16xf32> -> vector<2x8x16xf32>
    "tpu.trace_stop"() : () -> ()
    %227 = vector.shape_cast %226 : vector<2x8x16xf32> to vector<16x16xf32>
    %228 = vector.extract_strided_slice %174 {offsets = [16, 0], sizes = [16, 32], strides = [1, 1]} : vector<32x32xf32> to vector<16x32xf32>
    %cst_97 = arith.constant dense<0.000000e+00> : vector<16x32xf32>
    %229 = tpu.matmul %227, %228, %cst_97 {dimension_numbers = #tpu.dot_dimension_numbers<[1], [0], [0], [1], [0, 0, 1, 1], [], []>} : vector<16x16xf32>, vector<16x32xf32>, vector<16x32xf32> -> vector<16x32xf32>
    %230 = arith.addf %204, %229 : vector<16x32xf32>
    %c1_98 = arith.constant 1 : index
    %c0_99 = arith.constant 0 : index
    %c0_100 = arith.constant 0 : index
    %231 = vector.load %arg7[%c1_98, %c0_99, %c0_100] : memref<2x1x32xf32, #tpu.memory_space<vmem>>, vector<1x1x32xf32>
    %232 = vector.shape_cast %231 : vector<1x1x32xf32> to vector<1x32xf32>
    %233 = vector.broadcast %232 : vector<1x32xf32> to vector<16x32xf32>
    %234 = arith.addf %230, %233 : vector<16x32xf32>
    %235 = arith.addf %170, %234 : vector<16x32xf32>
    %c1_101 = arith.constant 1 : index
    %c0_102 = arith.constant 0 : index
    %c0_103 = arith.constant 0 : index
    %236 = vector.load %arg8[%c1_101, %c0_102, %c0_103] : memref<2x1x32xf32, #tpu.memory_space<vmem>>, vector<1x1x32xf32>
    %237 = vector.shape_cast %236 : vector<1x1x32xf32> to vector<1x32xf32>
    %c1_104 = arith.constant 1 : index
    %c0_105 = arith.constant 0 : index
    %c0_106 = arith.constant 0 : index
    %238 = vector.load %arg9[%c1_104, %c0_105, %c0_106] : memref<2x1x32xf32, #tpu.memory_space<vmem>>, vector<1x1x32xf32>
    %239 = vector.shape_cast %238 : vector<1x1x32xf32> to vector<1x32xf32>
    %cst_107 = arith.constant dense<0.000000e+00> : vector<16xf32>
    %240 = vector.multi_reduction <add>, %235, %cst_107 [1] : vector<16x32xf32> to vector<16xf32>
    %241 = vector.shape_cast %240 : vector<16xf32> to vector<16x1xf32>
    %cst_108 = arith.constant 3.200000e+01 : f32
    %242 = vector.broadcast %cst_108 : f32 to vector<16x1xf32>
    %243 = arith.divf %241, %242 : vector<16x1xf32>
    %244 = vector.broadcast %243 : vector<16x1xf32> to vector<16x32xf32>
    %245 = arith.subf %235, %244 : vector<16x32xf32>
    %246 = arith.mulf %245, %245 : vector<16x32xf32>
    %cst_109 = arith.constant dense<0.000000e+00> : vector<16xf32>
    %247 = vector.multi_reduction <add>, %246, %cst_109 [1] : vector<16x32xf32> to vector<16xf32>
    %248 = vector.shape_cast %247 : vector<16xf32> to vector<16x1xf32>
    %cst_110 = arith.constant 3.200000e+01 : f32
    %249 = vector.broadcast %cst_110 : f32 to vector<16x1xf32>
    %250 = arith.divf %248, %249 : vector<16x1xf32>
    %251 = vector.broadcast %243 : vector<16x1xf32> to vector<16x32xf32>
    %252 = arith.subf %235, %251 : vector<16x32xf32>
    %cst_111 = arith.constant 9.99999996E-13 : f32
    %253 = vector.broadcast %cst_111 : f32 to vector<16x1xf32>
    %254 = arith.addf %250, %253 : vector<16x1xf32>
    %255 = math.rsqrt %254 : vector<16x1xf32>
    %256 = vector.broadcast %255 : vector<16x1xf32> to vector<16x32xf32>
    %257 = arith.mulf %252, %256 : vector<16x32xf32>
    %258 = vector.broadcast %237 : vector<1x32xf32> to vector<16x32xf32>
    %259 = arith.mulf %257, %258 : vector<16x32xf32>
    %260 = vector.broadcast %239 : vector<1x32xf32> to vector<16x32xf32>
    %261 = arith.addf %259, %260 : vector<16x32xf32>
    %c1_112 = arith.constant 1 : index
    %c0_113 = arith.constant 0 : index
    %c0_114 = arith.constant 0 : index
    %262 = vector.load %arg10[%c1_112, %c0_113, %c0_114] : memref<2x32x64xf32, #tpu.memory_space<vmem>>, vector<1x32x64xf32>
    %263 = vector.shape_cast %262 : vector<1x32x64xf32> to vector<32x64xf32>
    %cst_115 = arith.constant dense<0.000000e+00> : vector<16x64xf32>
    %264 = tpu.matmul %261, %263, %cst_115 {dimension_numbers = #tpu.dot_dimension_numbers<[1], [0], [0], [1], [0, 0, 1, 1], [], []>} : vector<16x32xf32>, vector<32x64xf32>, vector<16x64xf32> -> vector<16x64xf32>
    %c1_116 = arith.constant 1 : index
    %c0_117 = arith.constant 0 : index
    %c0_118 = arith.constant 0 : index
    %265 = vector.load %arg11[%c1_116, %c0_117, %c0_118] : memref<2x1x64xf32, #tpu.memory_space<vmem>>, vector<1x1x64xf32>
    %266 = vector.shape_cast %265 : vector<1x1x64xf32> to vector<1x64xf32>
    %267 = vector.broadcast %266 : vector<1x64xf32> to vector<16x64xf32>
    %268 = arith.addf %264, %267 : vector<16x64xf32>
    %269 = arith.mulf %268, %268 : vector<16x64xf32>
    %270 = arith.mulf %268, %269 : vector<16x64xf32>
    %cst_119 = arith.constant 4.471500e-02 : f32
    %271 = vector.broadcast %cst_119 : f32 to vector<16x64xf32>
    %272 = arith.mulf %271, %270 : vector<16x64xf32>
    %273 = arith.addf %268, %272 : vector<16x64xf32>
    %cst_120 = arith.constant 0.797884583 : f32
    %274 = vector.broadcast %cst_120 : f32 to vector<16x64xf32>
    %275 = arith.mulf %274, %273 : vector<16x64xf32>
    %276 = math.tanh %275 : vector<16x64xf32>
    %cst_121 = arith.constant 1.000000e+00 : f32
    %277 = vector.broadcast %cst_121 : f32 to vector<16x64xf32>
    %278 = arith.addf %277, %276 : vector<16x64xf32>
    %cst_122 = arith.constant 5.000000e-01 : f32
    %279 = vector.broadcast %cst_122 : f32 to vector<16x64xf32>
    %280 = arith.mulf %279, %278 : vector<16x64xf32>
    %281 = arith.mulf %268, %280 : vector<16x64xf32>
    %c1_123 = arith.constant 1 : index
    %c0_124 = arith.constant 0 : index
    %c0_125 = arith.constant 0 : index
    %282 = vector.load %arg12[%c1_123, %c0_124, %c0_125] : memref<2x64x32xf32, #tpu.memory_space<vmem>>, vector<1x64x32xf32>
    %283 = vector.shape_cast %282 : vector<1x64x32xf32> to vector<64x32xf32>
    %cst_126 = arith.constant dense<0.000000e+00> : vector<16x32xf32>
    %284 = tpu.matmul %281, %283, %cst_126 {dimension_numbers = #tpu.dot_dimension_numbers<[1], [0], [0], [1], [0, 0, 1, 1], [], []>} : vector<16x64xf32>, vector<64x32xf32>, vector<16x32xf32> -> vector<16x32xf32>
    %c1_127 = arith.constant 1 : index
    %c0_128 = arith.constant 0 : index
    %c0_129 = arith.constant 0 : index
    %285 = vector.load %arg13[%c1_127, %c0_128, %c0_129] : memref<2x1x32xf32, #tpu.memory_space<vmem>>, vector<1x1x32xf32>
    %286 = vector.shape_cast %285 : vector<1x1x32xf32> to vector<1x32xf32>
    %287 = vector.broadcast %286 : vector<1x32xf32> to vector<16x32xf32>
    %288 = arith.addf %284, %287 : vector<16x32xf32>
    %289 = arith.addf %261, %288 : vector<16x32xf32>
    %c1_130 = arith.constant 1 : index
    %c0_131 = arith.constant 0 : index
    %c0_132 = arith.constant 0 : index
    %290 = vector.load %arg14[%c1_130, %c0_131, %c0_132] : memref<2x1x32xf32, #tpu.memory_space<vmem>>, vector<1x1x32xf32>
    %291 = vector.shape_cast %290 : vector<1x1x32xf32> to vector<1x32xf32>
    %c1_133 = arith.constant 1 : index
    %c0_134 = arith.constant 0 : index
    %c0_135 = arith.constant 0 : index
    %292 = vector.load %arg15[%c1_133, %c0_134, %c0_135] : memref<2x1x32xf32, #tpu.memory_space<vmem>>, vector<1x1x32xf32>
    %293 = vector.shape_cast %292 : vector<1x1x32xf32> to vector<1x32xf32>
    %cst_136 = arith.constant dense<0.000000e+00> : vector<16xf32>
    %294 = vector.multi_reduction <add>, %289, %cst_136 [1] : vector<16x32xf32> to vector<16xf32>
    %295 = vector.shape_cast %294 : vector<16xf32> to vector<16x1xf32>
    %cst_137 = arith.constant 3.200000e+01 : f32
    %296 = vector.broadcast %cst_137 : f32 to vector<16x1xf32>
    %297 = arith.divf %295, %296 : vector<16x1xf32>
    %298 = vector.broadcast %297 : vector<16x1xf32> to vector<16x32xf32>
    %299 = arith.subf %289, %298 : vector<16x32xf32>
    %300 = arith.mulf %299, %299 : vector<16x32xf32>
    %cst_138 = arith.constant dense<0.000000e+00> : vector<16xf32>
    %301 = vector.multi_reduction <add>, %300, %cst_138 [1] : vector<16x32xf32> to vector<16xf32>
    %302 = vector.shape_cast %301 : vector<16xf32> to vector<16x1xf32>
    %cst_139 = arith.constant 3.200000e+01 : f32
    %303 = vector.broadcast %cst_139 : f32 to vector<16x1xf32>
    %304 = arith.divf %302, %303 : vector<16x1xf32>
    %305 = vector.broadcast %297 : vector<16x1xf32> to vector<16x32xf32>
    %306 = arith.subf %289, %305 : vector<16x32xf32>
    %cst_140 = arith.constant 9.99999996E-13 : f32
    %307 = vector.broadcast %cst_140 : f32 to vector<16x1xf32>
    %308 = arith.addf %304, %307 : vector<16x1xf32>
    %309 = math.rsqrt %308 : vector<16x1xf32>
    %310 = vector.broadcast %309 : vector<16x1xf32> to vector<16x32xf32>
    %311 = arith.mulf %306, %310 : vector<16x32xf32>
    %312 = vector.broadcast %291 : vector<1x32xf32> to vector<16x32xf32>
    %313 = arith.mulf %311, %312 : vector<16x32xf32>
    %314 = vector.broadcast %293 : vector<1x32xf32> to vector<16x32xf32>
    %315 = arith.addf %313, %314 : vector<16x32xf32>
    %316 = vector.shape_cast %315 : vector<16x32xf32> to vector<2x8x32xf32>
    %317 = vector.extract_strided_slice %316 {offsets = [0, 0, 0], sizes = [2, 1, 32], strides = [1, 1, 1]} : vector<2x8x32xf32> to vector<2x1x32xf32>
    %318 = vector.shape_cast %317 : vector<2x1x32xf32> to vector<2x32xf32>
    %c0_141 = arith.constant 0 : index
    %c0_142 = arith.constant 0 : index
    %319 = vector.load %arg16[%c0_141, %c0_142] : memref<2x32xf32, #tpu.memory_space<vmem>>, vector<2x32xf32>
    %320 = arith.mulf %318, %319 : vector<2x32xf32>
    %c0_143 = arith.constant 0 : index
    %c0_144 = arith.constant 0 : index
    %321 = vector.load %arg17[%c0_143, %c0_144] : memref<32x4xf32, #tpu.memory_space<vmem>>, vector<32x4xf32>
    %cst_145 = arith.constant dense<0.000000e+00> : vector<2x4xf32>
    %322 = tpu.matmul %320, %321, %cst_145 {dimension_numbers = #tpu.dot_dimension_numbers<[1], [0], [0], [1], [0, 0, 1, 1], [], []>} : vector<2x32xf32>, vector<32x4xf32>, vector<2x4xf32> -> vector<2x4xf32>
    %c0_146 = arith.constant 0 : index
    %c0_147 = arith.constant 0 : index
    %323 = vector.load %arg18[%c0_146, %c0_147] : memref<1x4xf32, #tpu.memory_space<vmem>>, vector<1x4xf32>
    %324 = vector.broadcast %323 : vector<1x4xf32> to vector<2x4xf32>
    %325 = arith.addf %322, %324 : vector<2x4xf32>
    %cst_148 = arith.constant dense<0xFF800000> : vector<2xf32>
    %326 = vector.multi_reduction <maximumf>, %325, %cst_148 [1] : vector<2x4xf32> to vector<2xf32>
    %327 = vector.shape_cast %326 : vector<2xf32> to vector<2x1xf32>
    %328 = vector.broadcast %327 : vector<2x1xf32> to vector<2x4xf32>
    %329 = arith.subf %325, %328 : vector<2x4xf32>
    %330 = math.exp %329 : vector<2x4xf32>
    %cst_149 = arith.constant dense<0.000000e+00> : vector<2xf32>
    %331 = vector.multi_reduction <add>, %330, %cst_149 [1] : vector<2x4xf32> to vector<2xf32>
    %332 = vector.shape_cast %331 : vector<2xf32> to vector<2x1xf32>
    %333 = math.log %332 : vector<2x1xf32>
    %334 = arith.addf %327, %333 : vector<2x1xf32>
    %335 = tpu.iota {dimensions = array<i32: 1>} : vector<2x4xi32>
    %c0_150 = arith.constant 0 : index
    %c0_151 = arith.constant 0 : index
    %336 = vector.load %arg19[%c0_150, %c0_151] : memref<2x1xi32, #tpu.memory_space<vmem>>, vector<2x1xi32>
    %337 = vector.broadcast %336 : vector<2x1xi32> to vector<2x4xi32>
    %338 = arith.cmpi eq, %335, %337 : vector<2x4xi32>
    %339 = arith.extui %338 : vector<2x4xi1> to vector<2x4xi32>
    %340 = arith.sitofp %339 : vector<2x4xi32> to vector<2x4xf32>
    %341 = arith.mulf %325, %340 : vector<2x4xf32>
    %cst_152 = arith.constant dense<0.000000e+00> : vector<2xf32>
    %342 = vector.multi_reduction <add>, %341, %cst_152 [1] : vector<2x4xf32> to vector<2xf32>
    %343 = vector.shape_cast %342 : vector<2xf32> to vector<2x1xf32>
    %344 = arith.subf %334, %343 : vector<2x1xf32>
    %345 = vector.shape_cast %344 : vector<2x1xf32> to vector<1x2x1xf32>
    %cst_153 = arith.constant dense<0.000000e+00> : vector<1xf32>
    %346 = vector.multi_reduction <add>, %345, %cst_153 [1, 2] : vector<1x2x1xf32> to vector<1xf32>
    %347 = vector.shape_cast %346 : vector<1xf32> to vector<1x1x1xf32>
    %348 = vector.extract %347[0, 0, 0] : f32 from vector<1x1x1xf32>
    %349 = vector.broadcast %348 : f32 to vector<1x1xf32>
    %cst_154 = arith.constant 2.000000e+00 : f32
    %350 = vector.broadcast %cst_154 : f32 to vector<1x1xf32>
    %351 = arith.divf %349, %350 : vector<1x1xf32>
    %c0_155 = arith.constant 0 : index
    %c0_156 = arith.constant 0 : index
    %352 = vector.load %arg20[%c0_155, %c0_156] : memref<1x1xf32, #tpu.memory_space<vmem>>, vector<1x1xf32>
    tpu.vector_store %arg20[%c0_155, %c0_156], %351 {strides = array<i32>} : memref<1x1xf32, #tpu.memory_space<vmem>>, vector<1x1xf32>,
    %353 = vector.broadcast %327 : vector<2x1xf32> to vector<2x4xf32>
    %354 = arith.cmpf oeq, %325, %353 : vector<2x4xf32>
    %c1073741824_i32 = arith.constant 1073741824 : i32
    %355 = vector.broadcast %c1073741824_i32 : i32 to vector<2x4xi32>
    %356 = arith.select %354, %335, %355 : vector<2x4xi1>, vector<2x4xi32>
    %cst_157 = arith.constant dense<2147483647> : vector<2xi32>
    %357 = vector.multi_reduction <minsi>, %356, %cst_157 [1] : vector<2x4xi32> to vector<2xi32>
    %358 = vector.shape_cast %357 : vector<2xi32> to vector<2x1xi32>
    %c0_158 = arith.constant 0 : index
    %c0_159 = arith.constant 0 : index
    %359 = vector.load %arg21[%c0_158, %c0_159] : memref<2x1xi32, #tpu.memory_space<vmem>>, vector<2x1xi32>
    tpu.vector_store %arg21[%c0_158, %c0_159], %358 {strides = array<i32>} : memref<2x1xi32, #tpu.memory_space<vmem>>, vector<2x1xi32>,
    return
  }
}

</mosaic_0001>

<bundles_post_ra>
// kernel: bert_forward.1
= control target key start
LH: loop header
LB: loop body
LE: loop exit
PB: predicated region body
PF: predicated region fallthrough
CT: control target
= control target key end

     0   :  { %s2172_s0 = inlined_call_operand.vmem [shape: f32[16,32], index: 0, kind: input, shape index: {}]   ;;  %s2173_s1 = inlined_call_operand.vmem [shape: f32[2,1,8], index: 1, kind: input, shape index: {}]   ;;  %s2174_s2 = inlined_call_operand.vmem [shape: f32[1,32], index: 2, kind: input, shape index: {}]   ;;  %s2175_s3 = inlined_call_operand.vmem [shape: f32[1,32], index: 3, kind: input, shape index: {}]   ;;  %s2176_s4 = inlined_call_operand.vmem [shape: f32[2,32,96], index: 4, kind: input, shape index: {}]   ;;  %s2177_s5 = inlined_call_operand.vmem [shape: f32[2,1,96], index: 5, kind: input, shape index: {}]   ;;  %s2178_s6 = inlined_call_operand.vmem [shape: f32[2,32,32], index: 6, kind: input, shape index: {}]   ;;  %s2179_s7 = inlined_call_operand.vmem [shape: f32[2,1,32], index: 7, kind: input, shape index: {}]   ;;  %s2180_s8 = inlined_call_operand.vmem [shape: f32[2,1,32], index: 8, kind: input, shape index: {}]   ;;  %s2181_s9 = inlined_call_operand.vmem [shape: f32[2,1,32], index: 9, kind: input, shape index: {}]   ;;  %s2182_s10 = inlined_call_operand.vmem [shape: f32[2,32,64], index: 10, kind: input, shape index: {}]   ;;  %s2183_s11 = inlined_call_operand.vmem [shape: f32[2,1,64], index: 11, kind: input, shape index: {}]   ;;  %s2184_s12 = inlined_call_operand.vmem [shape: f32[2,64,32], index: 12, kind: input, shape index: {}]   ;;  %s2185_s13 = inlined_call_operand.vmem [shape: f32[2,1,32], index: 13, kind: input, shape index: {}]   ;;  %s2186_s14 = inlined_call_operand.vmem [shape: f32[2,1,32], index: 14, kind: input, shape index: {}]   ;;  %s2187_s15 = inlined_call_operand.vmem [shape: f32[2,1,32], index: 15, kind: input, shape index: {}]   ;;  %s2188_s16 = inlined_call_operand.vmem [shape: f32[2,32], index: 16, kind: input, shape index: {}]   ;;  %s2189_s17 = inlined_call_operand.vmem [shape: f32[32,4], index: 17, kind: input, shape index: {}]   ;;  %s2190_s18 = inlined_call_operand.vmem [shape: f32[1,4], index: 18, kind: input, shape index: {}]   ;;  %s2191_s19 = inlined_call_operand.vmem [shape: s32[2,1], index: 19, kind: input, shape index: {}]   ;;  %s2192_s20 = inlined_call_operand.hbm [shape: f32[1,1], index: 20, kind: output, shape index: {0}]   ;;  %s2193_s21 = inlined_call_operand.vmem [shape: s32[2,1], index: 21, kind: output, shape index: {1}]  }
   0x1   :  { %2200 = sst [smem:[#allocation5_spill]] %s2172_s0 }
   0x2   :  { %2201 = sst [smem:[#allocation6_spill]] %s2173_s1 }
   0x3   :  { %2202 = sst [smem:[#allocation7_spill]] %s2174_s2 }
   0x4   :  { %2203 = sst [smem:[#allocation8_spill]] %s2175_s3 }
   0x5   :  { %2204 = sst [smem:[#allocation9_spill]] %s2176_s4 }
   0x6   :  { %2205 = sst [smem:[#allocation10_spill]] %s2177_s5 }
   0x7   :  { %s2206_s26 = sld [smem:[#allocation5_spill]]  ;;  %vm72_vm0 = vcmask 261120  }
   0xd   :  { %v68_v0 = vld [vmem:[%s2206_s26] sm:$0xff]  ;;  %v69_v1 = vld [vmem:[%s2206_s26 + $0x8] sm:$0xff] }
   0xe   :  { %v73_v2 = vsel %vm72_vm0, %v68_v0, 0.0  ;;  %v76_v3 = vsel %vm72_vm0, %v69_v1, 0.0 }
   0xf   :  { %74 = vadd.xlane.f32.xlu0 %v73_v2  ;;  %77 = vadd.xlane.f32.xlu1 %v76_v3 }
  0x10   :  { %27 = vsyncpa [#allocation3], 0  ;;  %v1664_v4 = vmov 32.0   ;;  %s2207_s0 = sld [smem:[#allocation9_spill]]  ;;  %s1665_s30 = smov 96   ;;  %vm180_vm8 = vcmask 130048  }
  0x11   :  { %1570 = vrcp.f32 %v1664_v4  ;;  %s2208_s25 = sld [smem:[#allocation7_spill]]  ;;  %s2199_s5 = smov 64   ;;  %vm242_vm9 = vcmask 64512  }
  0x12   :  { %s2209_s3 = sld [smem:[#allocation8_spill]]  ;;  %s1667_s22 = smov 112  }
  0x13   :  { %s2210_s4 = sld [smem:[#allocation10_spill]]  ;;  %s1668_s23 = smov 80  }
  0x14   :  { %s2211_s2 = sld [smem:[#allocation6_spill]]  ;;  %s2198_s27 = smov 48  }
  0x15   :  { %s1673_s26 = smov [#allocation2]  }
  0x16   :  { %v139_v21 = vld [vmem:[%s2207_s0 + $0x18] sm:$0xff]  ;;  %v138_v22 = vld [vmem:[%s2207_s0 + $0x10] sm:$0xff]  ;;  %v137_v23 = vld [vmem:[%s2207_s0 + $0x8] sm:$0xff] }
  0x17   :  { %v1571_v5 = vpop.eup %1570  ;;  %166 = vmatpush.msra.mxu0 %v139_v21  ;;  %v136_v24 = vld [vmem:[%s2207_s0] sm:$0xff] }
  0x18   :  { %v80_v6 = vmul.f32 32.0, %v1571_v5  ;;  %vm84_vm1 = vweird.f32 %v1571_v5  ;;  %v1549_v43 = vld [vmem:[%s2208_s25] ss:$0 sm:$0xff] }
  0x19   :  { %167 = vmatpush.msra.mxu0 %v138_v22  ;;  %v1550_v47 = vld [vmem:[%s2209_s3] ss:$0 sm:$0xff]  ;;  %s1437_s3 = sshll.u32 %s1673_s26, 4  ;;  %s1438_s3 = int_to_ptr.vmem [resolvable:$true] %s1437_s3 }
  0x1a   :  { %v81_v7 = vsub.f32 1.0, %v80_v6  ;;  %v1551_v53 = vld [vmem:[%s2210_s4] ss:$0 sm:$0xff] }
  0x1b   :  { %168 = vmatpush.msra.mxu0 %v137_v23  ;;  %v1855_v62 = vld [vmem:[%s2211_s2] ss:$0 sm:$0xff] }
  0x1c   :  { %v82_v8 = vmul.f32 %v1571_v5, %v81_v7 }
  0x1d   :  { %169 = vmatpush.msra.mxu0 %v136_v24 }
  0x1e   :  { %v83_v9 = vadd.f32 %v1571_v5, %v82_v8 }
  0x20   :  { %v1792_v10 = vsel %vm84_vm1, %v1571_v5, %v83_v9  ;;  %vm640_vm1 = vcmask 523264  }
  0x82   :  { %v75_v11 = vpop.xlane.xlu0 %74  ;;  %v78_v12 = vpop.xlane.xlu1 %77 }
  0x83   :  { %v86_v13 = vmul.f32 %v1792_v10, %v75_v11  ;;  %v87_v14 = vmul.f32 %v1792_v10, %v78_v12  ;;  %v1865_v11 = vld [vmem:[%s2211_s2 + $0x1] ss:$0 sm:$0xff] }
  0x85   :  { %v88_v15 = vsub.f32 %v68_v0, %v86_v13  ;;  %v89_v16 = vsub.f32 %v69_v1, %v87_v14 }
  0x87   :  { %v90_v17 = vmul.f32 %v88_v15, %v88_v15  ;;  %v91_v18 = vmul.f32 %v89_v16, %v89_v16 }
  0x89   :  { %v92_v19 = vsel %vm72_vm0, %v90_v17, 0.0  ;;  %v95_v20 = vsel %vm72_vm0, %v91_v18, 0.0 }
  0x8a   :  { %93 = vadd.xlane.f32.xlu0 %v92_v19  ;;  %96 = vadd.xlane.f32.xlu2 %v95_v20 }
  0xfd   :  { %v94_v25 = vpop.xlane.xlu0 %93  ;;  %v97_v26 = vpop.xlane.xlu2 %96 }
  0xfe   :  { %v98_v27 = vmul.f32 %v94_v25, %v1792_v10  ;;  %v99_v28 = vmul.f32 %v97_v26, %v1792_v10  ;;  %v141_v25 = vld [vmem:[%s2178_s6 + $0x8] sm:$0xff]  ;;  %v140_v26 = vld [vmem:[%s2178_s6] sm:$0xff] }
  0xff   :  { %500 = vmatpush.msrb.mxu0 %v141_v25 }
 0x100   :  { %v100_v29 = vadd.f32 1e-12, %v98_v27  ;;  %v101_v30 = vadd.f32 1e-12, %v99_v28 }
 0x101   :  { %501 = vmatpush.msrb.mxu0 %v140_v26  ;;  %v575_v26 = vld [vmem:[%s2182_s10 + $0x10] sm:$0xff] }
 0x102   :  { %1572 = vrsqrt.f32 %v100_v29  ;;  %vm118_vm2 = vweird.f32 %v101_v30  ;;  %vm108_vm5 = vweird.f32 %v100_v29 }
 0x103   :  { %1574 = vrsqrt.f32 %v101_v30 }
 0x108   :  { %v1573_v31 = vpop.eup %1572 }
 0x109   :  { %v1575_v32 = vpop.eup %1574  ;;  %v103_v33 = vmul.f32 %v1573_v31, %v100_v29  ;;  %vm109_vm4 = vweird.f32 %v1573_v31 }
 0x10a   :  { %v113_v34 = vmul.f32 %v1575_v32, %v101_v30  ;;  %vm119_vm3 = vweird.f32 %v1575_v32  ;;  %vm110_vm7 = vmor %vm108_vm5, %vm109_vm4 }
 0x10b   :  { %v104_v35 = vmul.f32 %v1573_v31, %v103_v33  ;;  %vm120_vm6 = vmor %vm118_vm2, %vm119_vm3 }
 0x10c   :  { %v114_v36 = vmul.f32 %v1575_v32, %v113_v34 }
 0x10d   :  { %v105_v37 = vmul.f32 0.5, %v104_v35 }
 0x10e   :  { %v115_v38 = vmul.f32 0.5, %v114_v36 }
 0x10f   :  { %v106_v39 = vsub.f32 1.5, %v105_v37 }
 0x110   :  { %v116_v40 = vsub.f32 1.5, %v115_v38 }
 0x111   :  { %v107_v41 = vmul.f32 %v1573_v31, %v106_v39 }
 0x112   :  { %v117_v42 = vmul.f32 %v1575_v32, %v116_v40 }
 0x113   :  { %v111_v44 = vsel %vm110_vm7, %v1573_v31, %v107_v41 }
 0x114   :  { %v121_v45 = vsel %vm120_vm6, %v1575_v32, %v117_v42  ;;  %v122_v46 = vmul.f32 %v111_v44, %v88_v15 }
 0x115   :  { %v123_v49 = vmul.f32 %v121_v45, %v89_v16 }
 0x116   :  { %v127_v48 = vmul.f32 %v1549_v43, %v122_v46 }
 0x117   :  { %v128_v51 = vmul.f32 %v1549_v43, %v123_v49 }
 0x118   :  { %v1818_v50 = vadd.f32 %v1550_v47, %v127_v48 }
 0x119   :  { %v1822_v52 = vadd.f32 %v1550_v47, %v128_v51 }
 0x11a   :  { %1452 = vmatmul.msk.f32.vlgmr.msra.gmra.mxu0 %vm72_vm0, %v1818_v50 }
 0x122   :  { %1453 = vmatmul.msk.f32.gmra.mxu0 %vm72_vm0, %v1822_v52 }
 0x197   :  { %v171_v54 = vpop.f32.mrf.mxu0 }
 0x198   :  { %v1829_v55 = vadd.f32 %v1551_v53, %v171_v54  ;;  %v143_v54 = vld [vmem:[%s2178_s6 + $0x18] sm:$0xff] }
 0x19a   :  { %178 = vrot.lane.b32.xlu1 %v1829_v55, %s1665_s30 }
 0x19f   :  { %v174_v56 = vpop.f32.mrf.mxu0 }
 0x1a0   :  { %v1833_v57 = vadd.f32 %v1551_v53, %v174_v56 }
 0x1a2   :  { %206 = vrot.lane.b32.xlu0 %v1833_v57, %s1665_s30  ;;  %265 = vrot.lane.b32.xlu1 %v1829_v55, %s2199_s5 }
 0x1aa   :  { %317 = vrot.lane.b32.xlu0 %v1829_v55, %s1667_s22  ;;  %347 = vrot.lane.b32.xlu1 %v1833_v57, %s1668_s23 }
 0x1b2   :  { %345 = vrot.lane.b32.xlu0 %v1833_v57, %s1667_s22 }
 0x20c   :  { %v179_v58 = vpop.permute.xlu1 %178 }
 0x20d   :  { %1454 = vmatpush.xpose.msk.msra.mxu1 %vm180_vm8, %v179_v58 }
 0x210   :  { %1455 = vmatmul.msk.f32.vlgmr.msra.gmra.mxu1 %vm180_vm8, %v1829_v55 }
 0x214   :  { %v207_v59 = vpop.permute.xlu0 %206  ;;  %v266_v60 = vpop.permute.xlu1 %265 }
 0x215   :  { %1456 = vmatpush.xpose.msk.msra.mxu2 %vm180_vm8, %v207_v59 }
 0x218   :  { %1457 = vmatmul.msk.f32.vlgmr.msra.gmra.mxu2 %vm180_vm8, %v1833_v57 }
 0x219   :  { %286 = vmatpush.msrb.mxu2 %v266_v60 }
 0x21c   :  { %v348_v61 = vpop.permute.xlu1 %347  ;;  %v318_v18 = vpop.permute.xlu0 %317 }
 0x21d   :  { %1462 = vmatpush.xpose.msk.msra.mxu2 %vm180_vm8, %v348_v61 }
 0x224   :  { %v346_v19 = vpop.permute.xlu0 %345 }
 0x28d   :  { %v202_v63 = vpop.f32.mrf.mxu1 }
 0x28e   :  { %v232_v0 = vmul.f32 0.25, %v202_v63 }
 0x290   :  { %v240_v1 = vadd.f32 %v1855_v62, %v232_v0 }
 0x292   :  { %v243_v2 = vsel %vm242_vm9, %v240_v1, -inf }
 0x293   :  { %244 = vmax.xlane.f32.xlu2 %v243_v2  ;;  %v1554_v2 = vld [vmem:[%s2179_s7] ss:$0 sm:$0xff] }
 0x29b   :  { %v229_v8 = vpop.f32.mrf.mxu2 }
 0x29c   :  { %v233_v9 = vmul.f32 0.25, %v229_v8 }
 0x29e   :  { %v241_v12 = vadd.f32 %v1865_v11, %v233_v9 }
 0x2a0   :  { %v246_v13 = vsel %vm242_vm9, %v241_v12, -inf }
 0x306   :  { %v245_v3 = vpop.xlane.xlu2 %244 }
 0x307   :  { %v249_v4 = vsub.f32 %v240_v1, %v245_v3 }
 0x309   :  { %v251_v5 = vmul.f32 1.442695, %v249_v4 }
 0x30b   :  { %1576 = vpow2.f32 %v251_v5 }
 0x311   :  { %v1577_v6 = vpop.eup %1576 }
 0x312   :  { %v255_v7 = vsel %vm242_vm9, %v1577_v6, 0.0 }
 0x313   :  { %256 = vadd.xlane.f32.xlu2 %v255_v7 }
 0x32b   :  { %319 = vrot.lane.b32.xlu2 %v1829_v55, %s1668_s23 }
 0x354   :  { %247 = vmax.xlane.f32.xlu2 %v246_v13 }
 0x386   :  { %v257_v14 = vpop.xlane.xlu2 %256 }
 0x387   :  { %1578 = vrcp.f32 %v257_v14 }
 0x38d   :  { %v1579_v15 = vpop.eup %1578 }
 0x38e   :  { %v320_v16 = vpop.permute.xlu2 %319  ;;  %v263_v17 = vmul.f32 %v1579_v15, %v1577_v6 }
 0x38f   :  { %1460 = vmatpush.xpose.msk.msrb.mxu1 %vm180_vm8, %v320_v16 }
 0x390   :  { %1458 = vmatmul.msk.f32.vlgmr.msrb.gmra.mxu2 %vm242_vm9, %v263_v17 }
 0x391   :  { %471 = vmatpush.msrb.mxu2 %v143_v54 }
 0x392   :  { %1461 = vmatmul.msk.f32.vlgmr.msrb.gmra.mxu1 %vm180_vm8, %v318_v18 }
 0x398   :  { %1463 = vmatmul.msk.f32.vlgmr.msra.gmra.mxu2 %vm180_vm8, %v346_v19 }
 0x3c7   :  { %v248_v20 = vpop.xlane.xlu2 %247 }
 0x3c8   :  { %v250_v21 = vsub.f32 %v241_v12, %v248_v20 }
 0x3ca   :  { %v253_v22 = vmul.f32 1.442695, %v250_v21 }
 0x3cc   :  { %1580 = vpow2.f32 %v253_v22 }
 0x3d2   :  { %v1581_v23 = vpop.eup %1580 }
 0x3d3   :  { %v258_v24 = vsel %vm242_vm9, %v1581_v23, 0.0 }
 0x3d4   :  { %259 = vadd.xlane.f32.xlu2 %v258_v24 }
 0x3ec   :  { %399 = vrot.lane.b32.xlu2 %v1829_v55, %s2198_s27 }
 0x40f   :  { %v342_v27 = vpop.f32.mrf.mxu1 }
 0x410   :  { %v373_v28 = vmul.f32 0.25, %v342_v27  ;;  %v574_v27 = vld [vmem:[%s2182_s10 + $0x8] sm:$0xff] }
 0x412   :  { %v375_v29 = vadd.f32 %v1855_v62, %v373_v28  ;;  %v573_v28 = vld [vmem:[%s2182_s10] sm:$0xff] }
 0x413   :  { %v288_v30 = vpop.f32.mrf.mxu2 }
 0x414   :  { %1468 = vmatmul.msk.f32.vlgmr.msrb.gmra.mxu0 %vm180_vm8, %v288_v30  ;;  %v377_v31 = vsel %vm242_vm9, %v375_v29, -inf }
 0x415   :  { %378 = vmax.xlane.f32.xlu1 %v377_v31 }
 0x41b   :  { %v370_v32 = vpop.f32.mrf.mxu2 }
 0x41c   :  { %v374_v33 = vmul.f32 0.25, %v370_v32 }
 0x41e   :  { %v376_v34 = vadd.f32 %v1865_v11, %v374_v33 }
 0x420   :  { %v380_v35 = vsel %vm242_vm9, %v376_v34, -inf }
 0x421   :  { %381 = vmax.xlane.f32.xlu0 %v380_v35 }
 0x435   :  { %291 = vrot.lane.b32.xlu0 %v1833_v57, %s2199_s5 }
 0x447   :  { %v260_v44 = vpop.xlane.xlu2 %259 }
 0x44f   :  { %v400_v51 = vpop.permute.xlu2 %399 }
 0x488   :  { %v379_v36 = vpop.xlane.xlu1 %378 }
 0x489   :  { %v383_v37 = vsub.f32 %v375_v29, %v379_v36 }
 0x48b   :  { %v385_v38 = vmul.f32 1.442695, %v383_v37 }
 0x48d   :  { %1582 = vpow2.f32 %v385_v38  ;;  %v1555_v38 = vld [vmem:[%s2180_s8] ss:$0 sm:$0xff] }
 0x491   :  { %v503_v3 = vpop.f32.mrf.mxu0 }
 0x493   :  { %v1583_v39 = vpop.eup %1582 }
 0x494   :  { %v382_v40 = vpop.xlane.xlu0 %381  ;;  %v389_v41 = vsel %vm242_vm9, %v1583_v39, 0.0 }
 0x495   :  { %v384_v42 = vsub.f32 %v376_v34, %v382_v40  ;;  %390 = vadd.xlane.f32.xlu1 %v389_v41 }
 0x497   :  { %v387_v43 = vmul.f32 1.442695, %v384_v42 }
 0x499   :  { %1584 = vpow2.f32 %v387_v43  ;;  %v1556_v43 = vld [vmem:[%s2181_s9] ss:$0 sm:$0xff] }
 0x49a   :  { %1586 = vrcp.f32 %v260_v44 }
 0x49f   :  { %v1585_v45 = vpop.eup %1584 }
 0x4a0   :  { %v392_v46 = vsel %vm242_vm9, %v1585_v45, 0.0  ;;  %v1587_v47 = vpop.eup %1586 }
 0x4a1   :  { %393 = vadd.xlane.f32.xlu1 %v392_v46  ;;  %v264_v49 = vmul.f32 %v1587_v47, %v1581_v23 }
 0x4a7   :  { %v292_v48 = vpop.permute.xlu0 %291 }
 0x4a8   :  { %312 = vmatpush.msra.mxu3 %v292_v48 }
 0x4a9   :  { %1459 = vmatmul.msk.f32.vlgmr.msra.gmra.mxu3 %vm242_vm9, %v264_v49 }
 0x4aa   :  { %420 = vmatpush.msrb.mxu3 %v400_v51 }
 0x4ba   :  { %425 = vrot.lane.b32.xlu1 %v1833_v57, %s2198_s27  ;;  %v142_v57 = vld [vmem:[%s2178_s6 + $0x10] sm:$0xff] }
 0x4bb   :  { %472 = vmatpush.msrb.mxu2 %v142_v57  ;;  %v632_v57 = vld [vmem:[%s2184_s12 + $0x20] sm:$0xff] }
 0x508   :  { %v391_v53 = vpop.xlane.xlu1 %390 }
 0x509   :  { %1588 = vrcp.f32 %v391_v53 }
 0x50f   :  { %v1589_v55 = vpop.eup %1588 }
 0x510   :  { %v397_v56 = vmul.f32 %v1589_v55, %v1583_v39 }
 0x512   :  { %1464 = vmatmul.msk.f32.vlgmr.msrb.gmra.mxu3 %vm242_vm9, %v397_v56 }
 0x514   :  { %v394_v58 = vpop.xlane.xlu1 %393 }
 0x515   :  { %1590 = vrcp.f32 %v394_v58 }
 0x51b   :  { %v1591_v59 = vpop.eup %1590 }
 0x51c   :  { %v398_v60 = vmul.f32 %v1591_v59, %v1585_v45 }
 0x52c   :  { %v314_v61 = vpop.f32.mrf.mxu3  ;;  %v426_v63 = vpop.permute.xlu1 %425 }
 0x52d   :  { %446 = vmatpush.msra.mxu1 %v426_v63  ;;  %1469 = vmatmul.msk.f32.gmra.mxu0 %vm180_vm8, %v314_v61  ;;  %v634_v61 = vld [vmem:[%s2184_s12 + $0x30] sm:$0xff]  ;;  %v633_v63 = vld [vmem:[%s2184_s12 + $0x28] sm:$0xff] }
 0x52e   :  { %1465 = vmatmul.msk.f32.vlgmr.msra.gmra.mxu1 %vm242_vm9, %v398_v60  ;;  %v635_v60 = vld [vmem:[%s2184_s12 + $0x38] sm:$0xff] }
 0x52f   :  { %655 = vmatpush.msrb.mxu1 %v635_v60 }
 0x531   :  { %656 = vmatpush.msrb.mxu1 %v634_v61 }
 0x533   :  { %657 = vmatpush.msrb.mxu1 %v633_v63  ;;  %v1559_v63 = vld [vmem:[%s2186_s14] ss:$0 sm:$0xff] }
 0x535   :  { %658 = vmatpush.msrb.mxu1 %v632_v57 }
 0x595   :  { %v422_v0 = vpop.f32.mrf.mxu3 }
 0x596   :  { %1466 = vmatmul.msk.f32.vlgmr.msrb.gmra.mxu2 %vm180_vm8, %v422_v0  ;;  %v631_v0 = vld [vmem:[%s2184_s12 + $0x18] sm:$0xff] }
 0x597   :  { %659 = vmatpush.msrb.mxu1 %v631_v0 }
 0x5aa   :  { %v506_v9 = vpop.f32.mrf.mxu0 }
 0x5ab   :  { %v448_v1 = vpop.f32.mrf.mxu1 }
 0x5ac   :  { %1467 = vmatmul.msk.f32.gmra.mxu2 %vm180_vm8, %v448_v1  ;;  %v630_v1 = vld [vmem:[%s2184_s12 + $0x10] sm:$0xff] }
 0x5ad   :  { %660 = vmatpush.msrb.mxu1 %v630_v1 }
 0x619   :  { %v474_v4 = vpop.f32.mrf.mxu2 }
 0x61a   :  { %v504_v5 = vadd.f32 %v503_v3, %v474_v4  ;;  %v628_v3 = vld [vmem:[%s2184_s12] sm:$0xff] }
 0x61b   :  { %v1557_v4 = vld [vmem:[%s2183_s11] ss:$0 sm:$0xff] }
 0x61c   :  { %v513_v6 = vadd.f32 %v1554_v2, %v504_v5 }
 0x61e   :  { %v515_v7 = vadd.f32 %v513_v6, %v1818_v50 }
 0x620   :  { %v519_v8 = vsel %vm72_vm0, %v515_v7, 0.0 }
 0x621   :  { %520 = vadd.xlane.f32.xlu0 %v519_v8 }
 0x62f   :  { %v477_v12 = vpop.f32.mrf.mxu2 }
 0x630   :  { %v507_v13 = vadd.f32 %v506_v9, %v477_v12 }
 0x632   :  { %v514_v14 = vadd.f32 %v1554_v2, %v507_v13  ;;  %v629_v2 = vld [vmem:[%s2184_s12 + $0x8] sm:$0xff] }
 0x633   :  { %661 = vmatpush.msrb.mxu1 %v629_v2 }
 0x634   :  { %v516_v15 = vadd.f32 %v514_v14, %v1822_v52  ;;  %v576_v52 = vld [vmem:[%s2182_s10 + $0x18] sm:$0xff] }
 0x635   :  { %599 = vmatpush.msra.mxu3 %v576_v52  ;;  %662 = vmatpush.msrb.mxu1 %v628_v3  ;;  %v1560_v3 = vld [vmem:[%s2187_s15] ss:$0 sm:$0xff] }
 0x636   :  { %v522_v16 = vsel %vm72_vm0, %v516_v15, 0.0 }
 0x637   :  { %523 = vadd.xlane.f32.xlu2 %v522_v16  ;;  %600 = vmatpush.msra.mxu3 %v575_v26 }
 0x639   :  { %601 = vmatpush.msra.mxu3 %v574_v27  ;;  %v1558_v27 = vld [vmem:[%s2185_s13] ss:$0 sm:$0xff] }
 0x63b   :  { %602 = vmatpush.msra.mxu3 %v573_v28 }
 0x694   :  { %v521_v17 = vpop.xlane.xlu0 %520 }
 0x695   :  { %v525_v18 = vmul.f32 %v521_v17, %v1792_v10 }
 0x697   :  { %v527_v19 = vsub.f32 %v515_v7, %v525_v18 }
 0x699   :  { %v529_v20 = vmul.f32 %v527_v19, %v527_v19 }
 0x69b   :  { %v531_v21 = vsel %vm72_vm0, %v529_v20, 0.0 }
 0x69c   :  { %532 = vadd.xlane.f32.xlu1 %v531_v21 }
 0x6aa   :  { %v524_v50 = vpop.xlane.xlu2 %523 }
 0x6ab   :  { %v526_v22 = vmul.f32 %v524_v50, %v1792_v10 }
 0x6ad   :  { %v528_v23 = vsub.f32 %v516_v15, %v526_v22 }
 0x6af   :  { %v530_v24 = vmul.f32 %v528_v23, %v528_v23 }
 0x6b1   :  { %v534_v25 = vsel %vm72_vm0, %v530_v24, 0.0 }
 0x6b2   :  { %535 = vadd.xlane.f32.xlu0 %v534_v25 }
 0x70f   :  { %v533_v29 = vpop.xlane.xlu1 %532 }
 0x710   :  { %v537_v30 = vmul.f32 %v533_v29, %v1792_v10 }
 0x712   :  { %v539_v31 = vadd.f32 1e-12, %v537_v30 }
 0x714   :  { %1592 = vrsqrt.f32 %v539_v31  ;;  %vm547_vm11 = vweird.f32 %v539_v31 }
 0x71a   :  { %v1593_v32 = vpop.eup %1592 }
 0x71b   :  { %v542_v33 = vmul.f32 %v1593_v32, %v539_v31  ;;  %vm548_vm10 = vweird.f32 %v1593_v32 }
 0x71c   :  { %vm549_vm12 = vmor %vm547_vm11, %vm548_vm10 }
 0x71d   :  { %v543_v34 = vmul.f32 %v1593_v32, %v542_v33 }
 0x71f   :  { %v544_v35 = vmul.f32 0.5, %v543_v34 }
 0x721   :  { %v545_v36 = vsub.f32 1.5, %v544_v35 }
 0x723   :  { %v546_v37 = vmul.f32 %v1593_v32, %v545_v36 }
 0x725   :  { %v550_v39 = vsel %vm549_vm12, %v1593_v32, %v546_v37  ;;  %v536_v40 = vpop.xlane.xlu0 %535 }
 0x726   :  { %v561_v41 = vmul.f32 %v550_v39, %v527_v19  ;;  %v538_v42 = vmul.f32 %v536_v40, %v1792_v10 }
 0x728   :  { %v566_v44 = vmul.f32 %v1555_v38, %v561_v41  ;;  %v540_v45 = vadd.f32 1e-12, %v538_v42 }
 0x72a   :  { %1594 = vrsqrt.f32 %v540_v45  ;;  %v1936_v46 = vadd.f32 %v1556_v43, %v566_v44  ;;  %vm557_vm14 = vweird.f32 %v540_v45 }
 0x72c   :  { %1470 = vmatmul.msk.f32.vlgmr.msra.gmra.mxu3 %vm72_vm0, %v1936_v46 }
 0x730   :  { %v1595_v47 = vpop.eup %1594 }
 0x731   :  { %v552_v48 = vmul.f32 %v1595_v47, %v540_v45  ;;  %vm558_vm13 = vweird.f32 %v1595_v47 }
 0x732   :  { %vm559_vm15 = vmor %vm557_vm14, %vm558_vm13 }
 0x733   :  { %v553_v49 = vmul.f32 %v1595_v47, %v552_v48  ;;  %v1475_v48 = vld [vmem:[%s2207_s0 + $0x28] sm:$0xff] }
 0x735   :  { %v554_v51 = vmul.f32 0.5, %v553_v49  ;;  %v1474_v49 = vld [vmem:[%s2207_s0 + $0x20] sm:$0xff] }
 0x737   :  { %v555_v53 = vsub.f32 1.5, %v554_v51 }
 0x739   :  { %v556_v54 = vmul.f32 %v1595_v47, %v555_v53 }
 0x73b   :  { %v560_v55 = vsel %vm559_vm15, %v1595_v47, %v556_v54  ;;  %v1476_v47 = vld [vmem:[%s2207_s0 + $0x30] sm:$0xff] }
 0x73c   :  { %v562_v56 = vmul.f32 %v560_v55, %v528_v23 }
 0x73e   :  { %v567_v58 = vmul.f32 %v1555_v38, %v562_v56 }
 0x740   :  { %v572_v59 = vadd.f32 %v1556_v43, %v567_v58 }
 0x742   :  { %1471 = vmatmul.msk.f32.gmra.mxu3 %vm72_vm0, %v572_v59 }
 0x7af   :  { %v604_v5 = vpop.f32.mrf.mxu3 }
 0x7b0   :  { %v605_v6 = vadd.f32 %v1557_v4, %v604_v5 }
 0x7b2   :  { %v610_v7 = vmul.f32 %v605_v6, %v605_v6 }
 0x7b4   :  { %v612_v8 = vmul.f32 %v610_v7, %v605_v6 }
 0x7b6   :  { %v614_v9 = vmul.f32 0.044715, %v612_v8 }
 0x7b8   :  { %v616_v12 = vadd.f32 %v614_v9, %v605_v6 }
 0x7ba   :  { %v618_v13 = vmul.f32 0.7978846, %v616_v12 }
 0x7bc   :  { %1596 = vtanh.f32 %v618_v13 }
 0x7c2   :  { %v1597_v14 = vpop.eup %1596 }
 0x7c3   :  { %v622_v15 = vadd.f32 1.0, %v1597_v14 }
 0x7c5   :  { %v624_v16 = vmul.f32 0.5, %v622_v15  ;;  %v607_v17 = vpop.f32.mrf.mxu3 }
 0x7c6   :  { %v608_v18 = vadd.f32 %v1557_v4, %v607_v17 }
 0x7c7   :  { %v626_v19 = vmul.f32 %v624_v16, %v605_v6 }
 0x7c8   :  { %v611_v20 = vmul.f32 %v608_v18, %v608_v18 }
 0x7c9   :  { %1472 = vmatmul.msk.f32.vlgmr.msrb.gmra.mxu1 %vm640_vm1, %v626_v19  ;;  %v1561_v19 = vld [vmem:[%s2210_s4 + $0x1] ss:$0 sm:$0xff]  ;;  %s2212_s4 = smov 64  }
 0x7ca   :  { %v613_v21 = vmul.f32 %v611_v20, %v608_v18 }
 0x7cc   :  { %v615_v50 = vmul.f32 0.044715, %v613_v21 }
 0x7ce   :  { %v617_v22 = vadd.f32 %v615_v50, %v608_v18 }
 0x7d0   :  { %v619_v23 = vmul.f32 0.7978846, %v617_v22 }
 0x7d2   :  { %1598 = vtanh.f32 %v619_v23 }
 0x7d8   :  { %v1599_v24 = vpop.eup %1598 }
 0x7d9   :  { %v623_v25 = vadd.f32 1.0, %v1599_v24 }
 0x7db   :  { %v625_v52 = vmul.f32 0.5, %v623_v25 }
 0x7dd   :  { %v627_v26 = vmul.f32 %v625_v52, %v608_v18 }
 0x7df   :  { %1473 = vmatmul.msk.f32.gmra.mxu1 %vm640_vm1, %v627_v26 }
 0x846   :  { %v664_v28 = vpop.f32.mrf.mxu1 }
 0x847   :  { %v665_v29 = vadd.f32 %v1558_v27, %v664_v28 }
 0x849   :  { %v670_v30 = vadd.f32 %v665_v29, %v1936_v46  ;;  %v1477_v46 = vld [vmem:[%s2207_s0 + $0x38] sm:$0xff] }
 0x84a   :  { %761 = vmatpush.msra.mxu2 %v1477_v46 }
 0x84b   :  { %v674_v31 = vsel %vm72_vm0, %v670_v30, 0.0 }
 0x84c   :  { %675 = vadd.xlane.f32.xlu2 %v674_v31  ;;  %762 = vmatpush.msra.mxu2 %v1476_v47 }
 0x84e   :  { %763 = vmatpush.msra.mxu2 %v1475_v48 }
 0x850   :  { %764 = vmatpush.msra.mxu2 %v1474_v49 }
 0x85c   :  { %v667_v32 = vpop.f32.mrf.mxu1 }
 0x85d   :  { %v668_v33 = vadd.f32 %v1558_v27, %v667_v32 }
 0x85f   :  { %v671_v34 = vadd.f32 %v668_v33, %v572_v59 }
 0x861   :  { %v677_v35 = vsel %vm72_vm0, %v671_v34, 0.0 }
 0x862   :  { %678 = vadd.xlane.f32.xlu0 %v677_v35 }
 0x8bf   :  { %v676_v36 = vpop.xlane.xlu2 %675 }
 0x8c0   :  { %v680_v37 = vmul.f32 %v676_v36, %v1792_v10 }
 0x8c2   :  { %v682_v38 = vsub.f32 %v670_v30, %v680_v37 }
 0x8c4   :  { %v684_v39 = vmul.f32 %v682_v38, %v682_v38 }
 0x8c6   :  { %v686_v40 = vsel %vm72_vm0, %v684_v39, 0.0 }
 0x8c7   :  { %687 = vadd.xlane.f32.xlu2 %v686_v40 }
 0x8d5   :  { %v679_v41 = vpop.xlane.xlu0 %678 }
 0x8d6   :  { %v681_v42 = vmul.f32 %v679_v41, %v1792_v10 }
 0x8d8   :  { %v683_v43 = vsub.f32 %v671_v34, %v681_v42 }
 0x8da   :  { %v685_v44 = vmul.f32 %v683_v43, %v683_v43 }
 0x8dc   :  { %v689_v45 = vsel %vm72_vm0, %v685_v44, 0.0 }
 0x8dd   :  { %690 = vadd.xlane.f32.xlu0 %v689_v45 }
 0x93a   :  { %v688_v51 = vpop.xlane.xlu2 %687 }
 0x93b   :  { %v692_v53 = vmul.f32 %v688_v51, %v1792_v10 }
 0x93d   :  { %v694_v54 = vadd.f32 1e-12, %v692_v53 }
 0x93f   :  { %1600 = vrsqrt.f32 %v694_v54  ;;  %vm702_vm3 = vweird.f32 %v694_v54 }
 0x945   :  { %v1601_v55 = vpop.eup %1600 }
 0x946   :  { %v697_v56 = vmul.f32 %v1601_v55, %v694_v54  ;;  %vm703_vm2 = vweird.f32 %v1601_v55 }
 0x947   :  { %vm704_vm4 = vmor %vm702_vm3, %vm703_vm2 }
 0x948   :  { %v698_v58 = vmul.f32 %v1601_v55, %v697_v56 }
 0x94a   :  { %v699_v59 = vmul.f32 0.5, %v698_v58 }
 0x94c   :  { %v700_v60 = vsub.f32 1.5, %v699_v59 }
 0x94e   :  { %v701_v61 = vmul.f32 %v1601_v55, %v700_v60 }
 0x950   :  { %v705_v57 = vsel %vm704_vm4, %v1601_v55, %v701_v61  ;;  %v691_v0 = vpop.xlane.xlu0 %690 }
 0x951   :  { %v716_v1 = vmul.f32 %v705_v57, %v682_v38  ;;  %v693_v2 = vmul.f32 %v691_v0, %v1792_v10 }
 0x953   :  { %v721_v4 = vmul.f32 %v1559_v63, %v716_v1  ;;  %v695_v5 = vadd.f32 1e-12, %v693_v2 }
 0x955   :  { %1602 = vrsqrt.f32 %v695_v5  ;;  %v2000_v6 = vadd.f32 %v1560_v3, %v721_v4  ;;  %vm712_vm6 = vweird.f32 %v695_v5 }
 0x957   :  { %1483 = vmatmul.msk.f32.vlgmr.msra.gmra.mxu2 %vm72_vm0, %v2000_v6 }
 0x95b   :  { %v1603_v7 = vpop.eup %1602 }
 0x95c   :  { %v707_v8 = vmul.f32 %v1603_v7, %v695_v5  ;;  %vm713_vm5 = vweird.f32 %v1603_v7 }
 0x95d   :  { %vm714_vm7 = vmor %vm712_vm6, %vm713_vm5  ;;  %vm1341_vm5 = vcmask 1041409   ;;  %vm1365_vm6 = vcmask 25600  }
 0x95e   :  { %v708_v9 = vmul.f32 %v1603_v7, %v707_v8 }
 0x960   :  { %v709_v12 = vmul.f32 0.5, %v708_v9  ;;  %v1479_v9 = vld [vmem:[%s2178_s6 + $0x28] sm:$0xff] }
 0x962   :  { %v710_v13 = vsub.f32 1.5, %v709_v12 }
 0x964   :  { %v711_v14 = vmul.f32 %v1603_v7, %v710_v13 }
 0x966   :  { %v715_v15 = vsel %vm714_vm7, %v1603_v7, %v711_v14 }
 0x967   :  { %v717_v16 = vmul.f32 %v715_v15, %v683_v43 }
 0x969   :  { %v722_v17 = vmul.f32 %v1559_v63, %v717_v16 }
 0x96b   :  { %v2004_v18 = vadd.f32 %v1560_v3, %v722_v17 }
 0x96d   :  { %1484 = vmatmul.msk.f32.gmra.mxu2 %vm72_vm0, %v2004_v18 }
 0x9da   :  { %v766_v20 = vpop.f32.mrf.mxu2 }
 0x9db   :  { %v767_v21 = vadd.f32 %v1561_v19, %v766_v20 }
 0x9dd   :  { %773 = vrot.lane.b32.xlu2 %v767_v21, %s1665_s30 }
 0x9e5   :  { %904 = vrot.lane.b32.xlu2 %v767_v21, %s1667_s22 }
 0x9f0   :  { %v769_v50 = vpop.f32.mrf.mxu2 }
 0x9f1   :  { %v770_v22 = vadd.f32 %v1561_v19, %v769_v50 }
 0x9f3   :  { %934 = vrot.lane.b32.xlu0 %v770_v22, %s1668_s23  ;;  %800 = vrot.lane.b32.xlu1 %v770_v22, %s1665_s30  ;;  %v1538_v49 = vpack.i.bf16 %v770_v22, %v767_v21  ;;  %s2213_s30 = smov 48  }
 0x9fb   :  { %932 = vrot.lane.b32.xlu1 %v770_v22, %s1667_s22  ;;  %906 = vrot.lane.b32.xlu0 %v767_v21, %s1668_s23  ;;  %s1439_s22 = sshll.u32 %s2192_s20, 4  ;;  %s1440_s22 = int_to_ptr.hbm [resolvable:$true] %s1439_s22 }
 0xa37   :  { %v774_v23 = vpop.permute.xlu2 %773 }
 0xa38   :  { %1485 = vmatpush.xpose.msk.msra.mxu0 %vm180_vm8, %v774_v23 }
 0xa3b   :  { %1486 = vmatmul.msk.f32.vlgmr.msra.gmra.mxu0 %vm180_vm8, %v767_v21 }
 0xa3f   :  { %v905_v27 = vpop.permute.xlu2 %904 }
 0xa65   :  { %v935_v24 = vpop.permute.xlu0 %934  ;;  %v801_v25 = vpop.permute.xlu1 %800 }
 0xa66   :  { %1487 = vmatpush.xpose.msk.msrb.mxu3 %vm180_vm8, %v801_v25  ;;  %1493 = vmatpush.xpose.msk.msrb.mxu2 %vm180_vm8, %v935_v24  ;;  %v1478_v24 = vld [vmem:[%s2178_s6 + $0x20] sm:$0xff] }
 0xa69   :  { %1488 = vmatmul.msk.f32.vlgmr.msrb.gmra.mxu3 %vm180_vm8, %v770_v22 }
 0xa6a   :  { %1087 = vmatpush.msra.mxu2 %v1479_v9 }
 0xa6c   :  { %1088 = vmatpush.msra.mxu2 %v1478_v24  ;;  %v1517_v24 = vld [vmem:[%s2184_s12 + $0x70] sm:$0xff] }
 0xa6d   :  { %v933_v52 = vpop.permute.xlu1 %932  ;;  %v907_v26 = vpop.permute.xlu0 %906 }
 0xa6e   :  { %1491 = vmatpush.xpose.msk.msra.mxu1 %vm180_vm8, %v907_v26  ;;  %1494 = vmatmul.msk.f32.vlgmr.msrb.gmra.mxu2 %vm180_vm8, %v933_v52  ;;  %v1481_v52 = vld [vmem:[%s2178_s6 + $0x38] sm:$0xff]  ;;  %v1480_v26 = vld [vmem:[%s2178_s6 + $0x30] sm:$0xff] }
 0xa71   :  { %1492 = vmatmul.msk.f32.vlgmr.msra.gmra.mxu1 %vm180_vm8, %v905_v27 }
 0xa72   :  { %1058 = vmatpush.msrb.mxu1 %v1481_v52  ;;  %v1515_v52 = vld [vmem:[%s2184_s12 + $0x60] sm:$0xff] }
 0xa74   :  { %1059 = vmatpush.msrb.mxu1 %v1480_v26  ;;  %v1514_v26 = vld [vmem:[%s2184_s12 + $0x58] sm:$0xff] }
 0xab8   :  { %v796_v28 = vpop.f32.mrf.mxu0 }
 0xab9   :  { %v826_v29 = vmul.f32 0.25, %v796_v28 }
 0xabb   :  { %v828_v30 = vadd.f32 %v1855_v62, %v826_v29 }
 0xabd   :  { %v830_v31 = vsel %vm242_vm9, %v828_v30, -inf }
 0xabe   :  { %831 = vmax.xlane.f32.xlu1 %v830_v31 }
 0xaec   :  { %v823_v32 = vpop.f32.mrf.mxu3 }
 0xaed   :  { %v827_v33 = vmul.f32 0.25, %v823_v32 }
 0xaee   :  { %v929_v34 = vpop.f32.mrf.mxu1 }
 0xaef   :  { %v960_v35 = vmul.f32 0.25, %v929_v34  ;;  %v829_v36 = vadd.f32 %v1865_v11, %v827_v33 }
 0xaf1   :  { %v957_v37 = vpop.f32.mrf.mxu2  ;;  %v833_v38 = vsel %vm242_vm9, %v829_v36, -inf  ;;  %v962_v39 = vadd.f32 %v1855_v62, %v960_v35 }
 0xaf2   :  { %v961_v40 = vmul.f32 0.25, %v957_v37  ;;  %834 = vmax.xlane.f32.xlu0 %v833_v38 }
 0xaf3   :  { %v964_v41 = vsel %vm242_vm9, %v962_v39, -inf }
 0xaf4   :  { %965 = vmax.xlane.f32.xlu2 %v964_v41  ;;  %v963_v42 = vadd.f32 %v1865_v11, %v961_v40 }
 0xaf6   :  { %v967_v43 = vsel %vm242_vm9, %v963_v42, -inf }
 0xaf7   :  { %968 = vmax.xlane.f32.xlu1 %v967_v43 }
 0xb31   :  { %v832_v44 = vpop.xlane.xlu1 %831 }
 0xb32   :  { %v836_v45 = vsub.f32 %v828_v30, %v832_v44  ;;  %v1562_v30 = vld [vmem:[%s2179_s7 + $0x1] ss:$0 sm:$0xff] }
 0xb34   :  { %v838_v46 = vmul.f32 1.442695, %v836_v45 }
 0xb36   :  { %1604 = vpow2.f32 %v838_v46 }
 0xb3c   :  { %v1605_v47 = vpop.eup %1604 }
 0xb3d   :  { %v842_v48 = vsel %vm242_vm9, %v1605_v47, 0.0 }
 0xb3e   :  { %843 = vadd.xlane.f32.xlu0 %v842_v48 }
 0xb52   :  { %1539 = vrot.lane.b32.xlu0 %v1538_v49, %s2212_s4 }
 0xb65   :  { %v835_v62 = vpop.xlane.xlu0 %834 }
 0xb66   :  { %v837_v51 = vsub.f32 %v829_v36, %v835_v62 }
 0xb67   :  { %v966_v53 = vpop.xlane.xlu2 %965 }
 0xb68   :  { %v840_v54 = vmul.f32 1.442695, %v837_v51  ;;  %v970_v55 = vsub.f32 %v962_v39, %v966_v53  ;;  %v1506_v53 = vld [vmem:[%s2182_s10 + $0x30] sm:$0xff] }
 0xb6a   :  { %1606 = vpow2.f32 %v840_v54  ;;  %v972_v11 = vmul.f32 1.442695, %v970_v55  ;;  %v969_v56 = vpop.xlane.xlu1 %968  ;;  %v1505_v54 = vld [vmem:[%s2182_s10 + $0x28] sm:$0xff]  ;;  %v1504_v55 = vld [vmem:[%s2182_s10 + $0x20] sm:$0xff] }
 0xb6b   :  { %v971_v58 = vsub.f32 %v963_v42, %v969_v56 }
 0xb6c   :  { %1608 = vpow2.f32 %v972_v11 }
 0xb6d   :  { %v974_v59 = vmul.f32 1.442695, %v971_v58 }
 0xb6f   :  { %1610 = vpow2.f32 %v974_v59 }
 0xb70   :  { %v1607_v60 = vpop.eup %1606 }
 0xb71   :  { %v845_v61 = vsel %vm242_vm9, %v1607_v60, 0.0 }
 0xb72   :  { %v1609_v63 = vpop.eup %1608  ;;  %846 = vadd.xlane.f32.xlu2 %v845_v61 }
 0xb73   :  { %v976_v57 = vsel %vm242_vm9, %v1609_v63, 0.0 }
 0xb74   :  { %977 = vadd.xlane.f32.xlu1 %v976_v57 }
 0xb75   :  { %v1611_v0 = vpop.eup %1610 }
 0xb76   :  { %v979_v1 = vsel %vm242_vm9, %v1611_v0, 0.0 }
 0xb7a   :  { %980 = vadd.xlane.f32.xlu2 %v979_v1 }
 0xb8d   :  { %1544 = vrot.lane.b32.xlu1 %v1538_v49, %s2213_s30 }
 0xbb1   :  { %v844_v2 = vpop.xlane.xlu0 %843 }
 0xbb2   :  { %1612 = vrcp.f32 %v844_v2 }
 0xbb8   :  { %v1613_v3 = vpop.eup %1612 }
 0xbb9   :  { %v850_v8 = vmul.f32 %v1613_v3, %v1605_v47 }
 0xbc4   :  { %v1540_v4 = vpop.permute.xlu0 %1539 }
 0xbc5   :  { %v1542_v5 = vunpack.i.h.bf16 %v1540_v4  ;;  %v1541_v7 = vunpack.i.l.bf16 %v1540_v4 }
 0xbc7   :  { %873 = vmatpush.msrb.mxu0 %v1541_v7  ;;  %899 = vmatpush.msra.mxu3 %v1542_v5  ;;  %v1563_v7 = vld [vmem:[%s2180_s8 + $0x1] ss:$0 sm:$0xff] }
 0xbc8   :  { %1489 = vmatmul.msk.f32.vlgmr.msrb.gmra.mxu0 %vm242_vm9, %v850_v8 }
 0xbe5   :  { %v847_v12 = vpop.xlane.xlu2 %846 }
 0xbe6   :  { %1614 = vrcp.f32 %v847_v12 }
 0xbe7   :  { %v978_v15 = vpop.xlane.xlu1 %977 }
 0xbe8   :  { %1616 = vrcp.f32 %v978_v15 }
 0xbec   :  { %v1615_v13 = vpop.eup %1614 }
 0xbed   :  { %v851_v14 = vmul.f32 %v1615_v13, %v1607_v60  ;;  %v981_v16 = vpop.xlane.xlu2 %980  ;;  %v1564_v13 = vld [vmem:[%s2181_s9 + $0x1] ss:$0 sm:$0xff] }
 0xbee   :  { %1618 = vrcp.f32 %v981_v16  ;;  %v1617_v17 = vpop.eup %1616 }
 0xbef   :  { %1490 = vmatmul.msk.f32.vlgmr.msra.gmra.mxu3 %vm242_vm9, %v851_v14  ;;  %v984_v22 = vmul.f32 %v1617_v17, %v1609_v63 }
 0xbf4   :  { %v1619_v19 = vpop.eup %1618 }
 0xbf5   :  { %v985_v23 = vmul.f32 %v1619_v19, %v1611_v0 }
 0xbff   :  { %v1545_v20 = vpop.permute.xlu1 %1544 }
 0xc00   :  { %v1547_v21 = vunpack.i.h.bf16 %v1545_v20  ;;  %v1546_v50 = vunpack.i.l.bf16 %v1545_v20 }
 0xc02   :  { %1007 = vmatpush.msra.mxu0 %v1546_v50  ;;  %1033 = vmatpush.msrb.mxu3 %v1547_v21 }
 0xc03   :  { %1495 = vmatmul.msk.f32.vlgmr.msra.gmra.mxu0 %vm242_vm9, %v984_v22  ;;  %1496 = vmatmul.msk.f32.vlgmr.msrb.gmra.mxu3 %vm242_vm9, %v985_v23  ;;  %v1518_v23 = vld [vmem:[%s2184_s12 + $0x78] sm:$0xff] }
 0xc04   :  { %1248 = vmatpush.msra.mxu3 %v1518_v23 }
 0xc06   :  { %1249 = vmatpush.msra.mxu3 %v1517_v24 }
 0xc45   :  { %v875_v25 = vpop.f32.mrf.mxu0 }
 0xc46   :  { %1499 = vmatmul.msk.f32.vlgmr.msra.gmra.mxu2 %vm180_vm8, %v875_v25  ;;  %v1516_v25 = vld [vmem:[%s2184_s12 + $0x68] sm:$0xff] }
 0xc47   :  { %1250 = vmatpush.msra.mxu3 %v1516_v25 }
 0xc49   :  { %1251 = vmatpush.msra.mxu3 %v1515_v52 }
 0xc4b   :  { %1252 = vmatpush.msra.mxu3 %v1514_v26 }
 0xc72   :  { %v901_v27 = vpop.f32.mrf.mxu3 }
 0xc73   :  { %1500 = vmatmul.msk.f32.gmra.mxu2 %vm180_vm8, %v901_v27  ;;  %v1513_v27 = vld [vmem:[%s2184_s12 + $0x50] sm:$0xff] }
 0xc74   :  { %1253 = vmatpush.msra.mxu3 %v1513_v27 }
 0xc80   :  { %v1009_v28 = vpop.f32.mrf.mxu0 }
 0xc81   :  { %1497 = vmatmul.msk.f32.vlgmr.msrb.gmra.mxu1 %vm180_vm8, %v1009_v28  ;;  %v1512_v28 = vld [vmem:[%s2184_s12 + $0x48] sm:$0xff] }
 0xc82   :  { %1254 = vmatpush.msra.mxu3 %v1512_v28 }
 0xc86   :  { %v1035_v29 = vpop.f32.mrf.mxu3 }
 0xc89   :  { %1498 = vmatmul.msk.f32.gmra.mxu1 %vm180_vm8, %v1035_v29  ;;  %v1511_v29 = vld [vmem:[%s2184_s12 + $0x40] sm:$0xff] }
 0xc8a   :  { %1255 = vmatpush.msra.mxu3 %v1511_v29  ;;  %v1567_v29 = vld [vmem:[%s2186_s14 + $0x1] ss:$0 sm:$0xff] }
 0xcc9   :  { %v1090_v31 = vpop.f32.mrf.mxu2 }
 0xcf6   :  { %v1093_v37 = vpop.f32.mrf.mxu2 }
 0xcfe   :  { %v1061_v32 = vpop.f32.mrf.mxu1 }
 0xcff   :  { %v1091_v33 = vadd.f32 %v1090_v31, %v1061_v32 }
 0xd01   :  { %v1101_v34 = vadd.f32 %v1562_v30, %v1091_v33 }
 0xd03   :  { %v1103_v35 = vadd.f32 %v1101_v34, %v2000_v6 }
 0xd05   :  { %v1109_v36 = vsel %vm72_vm0, %v1103_v35, 0.0 }
 0xd06   :  { %1110 = vadd.xlane.f32.xlu2 %v1109_v36  ;;  %v1064_v38 = vpop.f32.mrf.mxu1 }
 0xd07   :  { %v1094_v39 = vadd.f32 %v1093_v37, %v1064_v38 }
 0xd09   :  { %v1102_v40 = vadd.f32 %v1562_v30, %v1094_v39  ;;  %v1565_v30 = vld [vmem:[%s2183_s11 + $0x1] ss:$0 sm:$0xff] }
 0xd0b   :  { %v1104_v41 = vadd.f32 %v1102_v40, %v2004_v18  ;;  %v1507_v18 = vld [vmem:[%s2182_s10 + $0x38] sm:$0xff] }
 0xd0c   :  { %1191 = vmatpush.msrb.mxu0 %v1507_v18  ;;  %v1566_v18 = vld [vmem:[%s2185_s13 + $0x1] ss:$0 sm:$0xff] }
 0xd0d   :  { %v1112_v42 = vsel %vm72_vm0, %v1104_v41, 0.0 }
 0xd0e   :  { %1113 = vadd.xlane.f32.xlu2 %v1112_v42  ;;  %1192 = vmatpush.msrb.mxu0 %v1506_v53 }
 0xd10   :  { %1193 = vmatpush.msrb.mxu0 %v1505_v54 }
 0xd12   :  { %1194 = vmatpush.msrb.mxu0 %v1504_v55 }
 0xd79   :  { %v1111_v43 = vpop.xlane.xlu2 %1110 }
 0xd7a   :  { %v1115_v44 = vmul.f32 %v1111_v43, %v1792_v10 }
 0xd7c   :  { %v1117_v45 = vsub.f32 %v1103_v35, %v1115_v44 }
 0xd7e   :  { %v1119_v46 = vmul.f32 %v1117_v45, %v1117_v45 }
 0xd80   :  { %v1121_v47 = vsel %vm72_vm0, %v1119_v46, 0.0 }
 0xd81   :  { %1122 = vadd.xlane.f32.xlu0 %v1121_v47  ;;  %v1114_v6 = vpop.xlane.xlu2 %1113 }
 0xd82   :  { %v1116_v48 = vmul.f32 %v1114_v6, %v1792_v10 }
 0xd84   :  { %v1118_v49 = vsub.f32 %v1104_v41, %v1116_v48 }
 0xd86   :  { %v1120_v62 = vmul.f32 %v1118_v49, %v1118_v49 }
 0xd88   :  { %v1124_v51 = vsel %vm72_vm0, %v1120_v62, 0.0 }
 0xd89   :  { %1125 = vadd.xlane.f32.xlu2 %v1124_v51 }
 0xdf4   :  { %v1123_v11 = vpop.xlane.xlu0 %1122 }
 0xdf5   :  { %v1127_v56 = vmul.f32 %v1123_v11, %v1792_v10 }
 0xdf7   :  { %v1129_v58 = vadd.f32 1e-12, %v1127_v56 }
 0xdf9   :  { %1620 = vrsqrt.f32 %v1129_v58  ;;  %vm1137_vm9 = vweird.f32 %v1129_v58 }
 0xdfc   :  { %v1126_v59 = vpop.xlane.xlu2 %1125 }
 0xdfd   :  { %v1128_v60 = vmul.f32 %v1126_v59, %v1792_v10 }
 0xdff   :  { %v1621_v61 = vpop.eup %1620  ;;  %v1130_v63 = vadd.f32 1e-12, %v1128_v60 }
 0xe00   :  { %v1132_v57 = vmul.f32 %v1621_v61, %v1129_v58  ;;  %vm1138_vm8 = vweird.f32 %v1621_v61 }
 0xe01   :  { %1622 = vrsqrt.f32 %v1130_v63  ;;  %vm1139_vm10 = vmor %vm1137_vm9, %vm1138_vm8  ;;  %vm1147_vm12 = vweird.f32 %v1130_v63  ;;  %vm1392_vm8 = vcmask 1024  }
 0xe02   :  { %v1133_v0 = vmul.f32 %v1621_v61, %v1132_v57 }
 0xe04   :  { %v1134_v1 = vmul.f32 0.5, %v1133_v0 }
 0xe06   :  { %v1135_v2 = vsub.f32 1.5, %v1134_v1 }
 0xe07   :  { %v1623_v3 = vpop.eup %1622 }
 0xe08   :  { %v1136_v4 = vmul.f32 %v1621_v61, %v1135_v2  ;;  %v1142_v5 = vmul.f32 %v1623_v3, %v1130_v63  ;;  %vm1148_vm11 = vweird.f32 %v1623_v3 }
 0xe09   :  { %vm1149_vm13 = vmor %vm1147_vm12, %vm1148_vm11  ;;  %vm1412_vm11 = vcmask 0  }
 0xe0a   :  { %v1140_v8 = vsel %vm1139_vm10, %v1621_v61, %v1136_v4  ;;  %v1143_v9 = vmul.f32 %v1623_v3, %v1142_v5 }
 0xe0b   :  { %v1151_v12 = vmul.f32 %v1140_v8, %v1117_v45 }
 0xe0c   :  { %v1144_v14 = vmul.f32 0.5, %v1143_v9 }
 0xe0d   :  { %v1156_v15 = vmul.f32 %v1563_v7, %v1151_v12  ;;  %v1333_v12 = vld [vmem:[%s2189_s17 + $0x18] sm:$0xff] }
 0xe0e   :  { %v1145_v16 = vsub.f32 1.5, %v1144_v14  ;;  %1357 = vmatpush.msra.mxu1 %v1333_v12 }
 0xe0f   :  { %v1161_v17 = vadd.f32 %v1564_v13, %v1156_v15  ;;  %v1331_v15 = vld [vmem:[%s2189_s17 + $0x8] sm:$0xff] }
 0xe10   :  { %v1146_v19 = vmul.f32 %v1623_v3, %v1145_v16  ;;  %v1330_v16 = vld [vmem:[%s2189_s17] sm:$0xff] }
 0xe11   :  { %1509 = vmatmul.msk.f32.vlgmr.msrb.gmra.mxu0 %vm72_vm0, %v1161_v17 }
 0xe12   :  { %v1150_v20 = vsel %vm1149_vm13, %v1623_v3, %v1146_v19  ;;  %v1380_v19 = vld [vmem:[%s2191_s19] sm:$0x3] }
 0xe13   :  { %v1152_v21 = vmul.f32 %v1150_v20, %v1118_v49 }
 0xe15   :  { %v1157_v50 = vmul.f32 %v1563_v7, %v1152_v21  ;;  %v1670_v21 = vmov 0  }
 0xe16   :  { %1548 = vset.pattern.permute.xlu0 %v1670_v21 }
 0xe17   :  { %v1162_v22 = vadd.f32 %v1564_v13, %v1157_v50  ;;  %v1332_v13 = vld [vmem:[%s2189_s17 + $0x10] sm:$0xff]  ;;  %1382 = vperm.xlu0 %1548, %v1380_v19  }
 0xe18   :  { %1358 = vmatpush.msra.mxu1 %v1332_v13 }
 0xe19   :  { %1510 = vmatmul.msk.f32.gmra.mxu0 %vm72_vm0, %v1162_v22 }
 0xe1a   :  { %1359 = vmatpush.msra.mxu1 %v1331_v15 }
 0xe1c   :  { %1360 = vmatpush.msra.mxu1 %v1330_v16 }
 0xe8e   :  { %v1196_v31 = vpop.f32.mrf.mxu0 }
 0xe8f   :  { %v1197_v32 = vadd.f32 %v1565_v30, %v1196_v31 }
 0xe91   :  { %v1202_v33 = vmul.f32 %v1197_v32, %v1197_v32 }
 0xe93   :  { %v1204_v34 = vmul.f32 %v1202_v33, %v1197_v32 }
 0xe95   :  { %v1206_v35 = vmul.f32 0.044715, %v1204_v34  ;;  %v1568_v34 = vld [vmem:[%s2187_s15 + $0x1] ss:$0 sm:$0xff] }
 0xe96   :  { %v1199_v36 = vpop.f32.mrf.mxu0 }
 0xe97   :  { %v1208_v37 = vadd.f32 %v1206_v35, %v1197_v32  ;;  %v1200_v38 = vadd.f32 %v1565_v30, %v1199_v36  ;;  %v1323_v36 = vld [vmem:[%s2188_s16] sm:$0x3] }
 0xe99   :  { %v1210_v39 = vmul.f32 0.7978846, %v1208_v37  ;;  %v1203_v40 = vmul.f32 %v1200_v38, %v1200_v38 }
 0xe9b   :  { %1624 = vtanh.f32 %v1210_v39  ;;  %v1205_v41 = vmul.f32 %v1203_v40, %v1200_v38  ;;  %v1325_v39 = vrot.slane %v1323_v36, 1 }
 0xe9d   :  { %v1207_v42 = vmul.f32 0.044715, %v1205_v41 }
 0xe9f   :  { %v1209_v43 = vadd.f32 %v1207_v42, %v1200_v38 }
 0xea1   :  { %v1625_v44 = vpop.eup %1624  ;;  %v1211_v45 = vmul.f32 0.7978846, %v1209_v43 }
 0xea2   :  { %v1214_v46 = vadd.f32 1.0, %v1625_v44 }
 0xea3   :  { %1626 = vtanh.f32 %v1211_v45 }
 0xea4   :  { %v1216_v47 = vmul.f32 0.5, %v1214_v46 }
 0xea6   :  { %v1218_v6 = vmul.f32 %v1216_v47, %v1197_v32 }
 0xea8   :  { %1520 = vmatmul.msk.f32.vlgmr.msra.gmra.mxu3 %vm640_vm1, %v1218_v6  ;;  %v1569_v6 = vld [vmem:[%s2190_s18] ss:$0 sm:$0xff] }
 0xea9   :  { %v1627_v48 = vpop.eup %1626 }
 0xeaa   :  { %v1215_v49 = vadd.f32 1.0, %v1627_v48 }
 0xeac   :  { %v1217_v62 = vmul.f32 0.5, %v1215_v49 }
 0xeae   :  { %v1219_v51 = vmul.f32 %v1217_v62, %v1200_v38 }
 0xeb0   :  { %1521 = vmatmul.msk.f32.gmra.mxu3 %vm640_vm1, %v1219_v51 }
 0xf2b   :  { %v1257_v53 = vpop.f32.mrf.mxu3 }
 0xf2c   :  { %v1258_v54 = vadd.f32 %v1566_v18, %v1257_v53  ;;  %v1378_v53 = vlaneseq }
 0xf2e   :  { %v1263_v55 = vadd.f32 %v1258_v54, %v1161_v17 }
 0xf30   :  { %v1269_v11 = vsel %vm72_vm0, %v1263_v55, 0.0 }
 0xf31   :  { %1270 = vadd.xlane.f32.xlu2 %v1269_v11  ;;  %v1383_v11 = vpop.permute.xlu0 %1382 }
 0xf33   :  { %v1260_v56 = vpop.f32.mrf.mxu3 }
 0xf34   :  { %v1261_v58 = vadd.f32 %v1566_v18, %v1260_v56 }
 0xf36   :  { %v1264_v59 = vadd.f32 %v1261_v58, %v1162_v22 }
 0xf38   :  { %v1272_v60 = vsel %vm72_vm0, %v1264_v59, 0.0 }
 0xf39   :  { %1273 = vadd.xlane.f32.xlu1 %v1272_v60 }
 0xfa4   :  { %v1271_v61 = vpop.xlane.xlu2 %1270 }
 0xfa5   :  { %v1275_v0 = vmul.f32 %v1271_v61, %v1792_v10 }
 0xfa7   :  { %v1277_v3 = vsub.f32 %v1263_v55, %v1275_v0  ;;  %v1379_v55 = vand.u32 127, %v1378_v53 }
 0xfa9   :  { %v1279_v5 = vmul.f32 %v1277_v3, %v1277_v3  ;;  %vm1384_vm7 = vcmp.eq.s32.totalorder %v1379_v55, %v1383_v11 }
 0xfab   :  { %v1281_v7 = vsel %vm72_vm0, %v1279_v5, 0.0 }
 0xfac   :  { %v1274_v63 = vpop.xlane.xlu1 %1273 }
 0xfad   :  { %v1276_v57 = vmul.f32 %v1274_v63, %v1792_v10 }
 0xfaf   :  { %v1278_v1 = vsub.f32 %v1264_v59, %v1276_v57  ;;  %v1671_v59 = vmov 0.0  }
 0xfb0   :  { %v1525_v60 = vsel %vm1384_vm7, 1.0, %v1671_v59 }
 0xfb1   :  { %v1280_v2 = vmul.f32 %v1278_v1, %v1278_v1 }
 0xfb3   :  { %v1284_v4 = vsel %vm72_vm0, %v1280_v2, 0.0 }
 0xfb4   :  { %1285 = vadd.xlane.f32.xlu2 %v1284_v4 }
 0xfbc   :  { %1282 = vadd.xlane.f32.xlu2 %v1281_v7 }
0x1027   :  { %v1286_v8 = vpop.xlane.xlu2 %1285 }
0x1028   :  { %v1288_v9 = vmul.f32 %v1286_v8, %v1792_v10 }
0x102a   :  { %v1290_v14 = vadd.f32 1e-12, %v1288_v9 }
0x102c   :  { %1628 = vrsqrt.f32 %v1290_v14  ;;  %vm1307_vm15 = vweird.f32 %v1290_v14 }
0x102f   :  { %v1283_v17 = vpop.xlane.xlu2 %1282 }
0x1030   :  { %v1287_v20 = vmul.f32 %v1283_v17, %v1792_v10 }
0x1032   :  { %v1629_v50 = vpop.eup %1628  ;;  %v1289_v22 = vadd.f32 1e-12, %v1287_v20 }
0x1033   :  { %v1302_v23 = vmul.f32 %v1629_v50, %v1290_v14  ;;  %vm1308_vm14 = vweird.f32 %v1629_v50 }
0x1034   :  { %1630 = vrsqrt.f32 %v1289_v22  ;;  %vm1309_vm1 = vmor %vm1307_vm15, %vm1308_vm14  ;;  %vm1297_vm3 = vweird.f32 %v1289_v22 }
0x1035   :  { %v1303_v24 = vmul.f32 %v1629_v50, %v1302_v23 }
0x1037   :  { %v1304_v25 = vmul.f32 0.5, %v1303_v24 }
0x1039   :  { %v1305_v52 = vsub.f32 1.5, %v1304_v25 }
0x103a   :  { %v1631_v26 = vpop.eup %1630 }
0x103b   :  { %v1306_v27 = vmul.f32 %v1629_v50, %v1305_v52  ;;  %v1292_v28 = vmul.f32 %v1631_v26, %v1289_v22  ;;  %vm1298_vm2 = vweird.f32 %v1631_v26 }
0x103c   :  { %vm1299_vm4 = vmor %vm1297_vm3, %vm1298_vm2 }
0x103d   :  { %v1310_v10 = vsel %vm1309_vm1, %v1629_v50, %v1306_v27  ;;  %v1293_v30 = vmul.f32 %v1631_v26, %v1292_v28  ;;  %v1672_v28 = vmov 2.0  }
0x103e   :  { %v1312_v31 = vmul.f32 %v1310_v10, %v1278_v1 }
0x103f   :  { %v1294_v32 = vmul.f32 0.5, %v1293_v30 }
0x1040   :  { %v1317_v33 = vmul.f32 %v1567_v29, %v1312_v31 }
0x1041   :  { %v1295_v35 = vsub.f32 1.5, %v1294_v32 }
0x1042   :  { %v1322_v38 = vadd.f32 %v1568_v34, %v1317_v33 }
0x1043   :  { %v1296_v37 = vmul.f32 %v1631_v26, %v1295_v35 }
0x1044   :  { %v1329_v43 = vmul.f32 %v1325_v39, %v1322_v38 }
0x1045   :  { %v1300_v40 = vsel %vm1299_vm4, %v1631_v26, %v1296_v37 }
0x1046   :  { %v1311_v41 = vmul.f32 %v1300_v40, %v1277_v3  ;;  %v1340_v46 = vrot.slane %v1329_v43, 7 }
0x1048   :  { %v1316_v42 = vmul.f32 %v1567_v29, %v1311_v41 }
0x104a   :  { %v1321_v44 = vadd.f32 %v1568_v34, %v1316_v42 }
0x104c   :  { %v1328_v45 = vmul.f32 %v1323_v36, %v1321_v44 }
0x104e   :  { %v1342_v47 = vsel %vm1341_vm5, %v1340_v46, %v1328_v45 }
0x104f   :  { %1524 = vmatmul.msk.f32.vlgmr.msra.gmra.mxu1 %vm72_vm0, %v1342_v47 }
0x10cc   :  { %v1362_v48 = vpop.f32.mrf.mxu1 }
0x10cd   :  { %v1363_v49 = vadd.f32 %v1569_v6, %v1362_v48 }
0x10cf   :  { %v1366_v62 = vsel %vm1365_vm6, %v1363_v49, -inf  ;;  %v1387_v61 = vmul.f32 %v1525_v60, %v1363_v49 }
0x10d0   :  { %1367 = vmax.xlane.f32.xlu2 %v1366_v62 }
0x10d1   :  { %v1388_v57 = vsel %vm1365_vm6, %v1387_v61, 0.0 }
0x1143   :  { %v1368_v51 = vpop.xlane.xlu2 %1367 }
0x1144   :  { %v1369_v18 = vsub.f32 %v1363_v49, %v1368_v51  ;;  %vm1414_vm0 = vcmp.eq.f32.partialorder %v1363_v49, %v1368_v51 }
0x1145   :  { %v1415_v63 = vsel %vm1414_vm0, %v1379_v55, 1073741824 }
0x1146   :  { %v1370_v54 = vmul.f32 1.442695, %v1369_v18  ;;  %v1416_v0 = vsel %vm1365_vm6, %v1415_v63, 2147483647 }
0x1147   :  { %v1418_v1 = vshra.s32 %v1416_v0, 16  ;;  %v1417_v14 = vand.u32 65535, %v1416_v0 }
0x1148   :  { %1632 = vpow2.f32 %v1370_v54 }
0x1149   :  { %v1420_v2 = vcvt.s32.f32 %v1418_v1  ;;  %v1419_v15 = vcvt.s32.f32 %v1417_v14 }
0x114e   :  { %v1633_v56 = vpop.eup %1632 }
0x114f   :  { %v1372_v58 = vsel %vm1365_vm6, %v1633_v56, 0.0 }
0x1150   :  { %1373 = vadd.xlane.f32.xlu2 %v1372_v58 }
0x1158   :  { %1389 = vadd.xlane.f32.xlu2 %v1388_v57 }
0x1160   :  { %1421 = vmin.xlane.f32.xlu2 %v1420_v2 }
0x11c3   :  { %v1374_v3 = vpop.xlane.xlu2 %1373 }
0x11c4   :  { %1634 = vlog2.f32 %v1374_v3 }
0x11c5   :  { %1636 = vrcp.f32 %v1672_v28 }
0x11ca   :  { %v1635_v4 = vpop.eup %1634 }
0x11cb   :  { %v1376_v5 = vmul.f32 0.6931472, %v1635_v4  ;;  %v1390_v7 = vpop.xlane.xlu2 %1389  ;;  %v1637_v29 = vpop.eup %1636 }
0x11cc   :  { %v1405_v10 = vmul.f32 2.0, %v1637_v29  ;;  %vm1409_vm10 = vweird.f32 %v1637_v29 }
0x11cd   :  { %v1377_v8 = vadd.f32 %v1376_v5, %v1368_v51 }
0x11ce   :  { %v1406_v30 = vsub.f32 1.0, %v1405_v10 }
0x11cf   :  { %v1391_v9 = vsub.f32 %v1377_v8, %v1390_v7 }
0x11d0   :  { %v1407_v31 = vmul.f32 %v1637_v29, %v1406_v30 }
0x11d1   :  { %v1393_v12 = vsel %vm1392_vm8, %v1391_v9, 0.0 }
0x11d2   :  { %1394 = vadd.xlane.f32.xlu1 %v1393_v12  ;;  %v1408_v32 = vadd.f32 %v1637_v29, %v1407_v31 }
0x11d3   :  { %v1422_v13 = vpop.xlane.xlu2 %1421 }
0x11d4   :  { %vm1423_vm9 = vcmp.eq.f32.partialorder %v1420_v2, %v1422_v13  ;;  %v1428_v21 = vcvt.f32.s32 %v1422_v13  ;;  %v1410_v33 = vsel %vm1409_vm10, %v1637_v29, %v1408_v32 }
0x11d5   :  { %v1424_v16 = vsel %vm1423_vm9, %v1419_v15, inf }
0x11d6   :  { %v1429_v24 = vshll.u32 %v1428_v21, 16 }
0x11da   :  { %1425 = vmin.xlane.f32.xlu1 %v1424_v16 }
0x1245   :  { %v1395_v17 = vpop.xlane.xlu1 %1394 }
0x1246   :  { %v1396_v19 = vrot.slane %v1395_v17, 4 }
0x1248   :  { %v1397_v20 = vadd.f32 %v1396_v19, %v1395_v17 }
0x124a   :  { %v1398_v50 = vrot.slane %v1397_v20, 2 }
0x124c   :  { %v1399_v22 = vadd.f32 %v1398_v50, %v1397_v20 }
0x124d   :  { %v1426_v23 = vpop.xlane.xlu1 %1425 }
0x124e   :  { %v1427_v25 = vcvt.f32.s32 %v1426_v23  ;;  %v1400_v52 = vrot.slane %v1399_v22, 1 }
0x1250   :  { %v1430_v26 = vadd.s32 %v1429_v24, %v1427_v25  ;;  %v1401_v27 = vadd.f32 %v1400_v52, %v1399_v22 }
0x1252   :  { %1431 = vst.msk [vmem:[%s2193_s21] sm:$0x3] %vm1392_vm8, %v1430_v26 }
0x1253   :  { %1526 = vpush %v1401_v27 }
0x1284   :  { %s1527_s10 = spop %1526 }
0x1285   :  { %v1403_v34 = vstv %s1527_s10 }
0x1286   :  { %v1411_v35 = vmul.f32 %v1410_v33, %v1403_v34 }
0x1288   :  { %1413 = vst.msk [vmem:[#allocation2] sm:$0x1] %vm1412_vm11, %v1411_v35 }
0x1289   :  { %1442 = dma.vmem_to_hbm [thread:$0]  %s1438_s3, 16, %s1440_s22, [#allocation3]  }
0x128a   :  { %1662 = dma.done.wait [#allocation3], 16  }
0x128b   :  { %1663 = vsyncadd [#allocation3], 4294967280 }
0x128c   :  { %1451 = vsyncpa [#allocation3], 1 }

</bundles_post_ra>
